<compile_context>
chip_gen: v6e
topology: v6e:2x2x1
jax: 0.10.0
libtpu: 0.0.40
codegen_flags: <defaults>
</compile_context>

<pallas_src>
import jax
import jax.numpy as jnp
from jax.experimental import pallas as pl
from jax.experimental.pallas import tpu as pltpu


MXU_DTYPE = jnp.bfloat16  # matmul-input dtype; accumulation + elementwise stay f32


# --------------------------------------------------------------------------
# Pallas kernel: whole forward pass (attention + GRU + fc) in one body.
# --------------------------------------------------------------------------
def attn_rnn_kernel(x_ref, w_qkv_ref, w_ih_ref, w_hh_ref, w_fc_ref, b_ref,
                    out_ref):
    x = x_ref[...]                               # (B, T, D) f32
    B, T, _ = x.shape
    A = w_qkv_ref.shape[1] // 3                  # attention_dim
    H = w_hh_ref.shape[0]                        # rnn_hidden_size
    C = out_ref.shape[1]                         # num_classes

    # ---- fused Q/K/V projection: one (B,T,D)x(D,3A) matmul -----------------
    qkv = jnp.einsum('btd,da->bta',
                     x.astype(MXU_DTYPE), w_qkv_ref[...].astype(MXU_DTYPE),
                     preferred_element_type=jnp.float32)
    qkv = qkv + b_ref[0:1, 0:3 * A].reshape(1, 1, 3 * A)
    Q = qkv[:, :, 0:A]
    K = qkv[:, :, A:2 * A]
    V = qkv[:, :, 2 * A:3 * A]

    # ---- scaled dot-product self-attention ----------------------------------
    scores = jnp.einsum('bta,bsa->bts',
                        Q.astype(MXU_DTYPE), K.astype(MXU_DTYPE),
                        preferred_element_type=jnp.float32)
    scores = scores * (1.0 / (float(A) ** 0.5))
    m = jnp.max(scores, axis=-1, keepdims=True)
    p = jnp.exp(scores - m)
    attn_w = p * pl.reciprocal(jnp.sum(p, axis=-1, keepdims=True), approx=True)
    attn = jnp.einsum('bts,bsa->bta',
                      attn_w.astype(MXU_DTYPE), V.astype(MXU_DTYPE),
                      preferred_element_type=jnp.float32)     # (B, T, A)

    # ---- GRU input-side gates: one fused (B,T,A)x(A,3H) matmul --------------
    # bias row 1 is pre-folded to [b_ir + b_hr | b_iz + b_hz | b_in].
    gi = jnp.einsum('bta,ah->bth',
                    attn.astype(MXU_DTYPE), w_ih_ref[...].astype(MXU_DTYPE),
                    preferred_element_type=jnp.float32)
    gi = gi + b_ref[1:2, 0:3 * H].reshape(1, 1, 3 * H)        # (B, T, 3H)

    # ---- GRU recurrence (num_layers=1, h0 = 0); one matmul per step ----------
    w_hh = w_hh_ref[...].astype(MXU_DTYPE)                    # (H, 3H), hoisted
    b_hn = jnp.broadcast_to(b_ref[2:3, 0:H], (B, H))          # hoisted once
    h = jnp.zeros((B, H), jnp.float32)
    for t in range(T):                                        # static unroll
        gh = jnp.dot(h.astype(MXU_DTYPE), w_hh,
                     preferred_element_type=jnp.float32)      # (B, 3H)
        gt = gi[:, t, :]
        r = jax.nn.sigmoid(gt[:, 0:H] + gh[:, 0:H])
        z = jax.nn.sigmoid(gt[:, H:2 * H] + gh[:, H:2 * H])
        n = jnp.tanh(gt[:, 2 * H:3 * H] + r * (gh[:, 2 * H:3 * H] + b_hn))
        h = (1.0 - z) * n + z * h

    # ---- classifier head on the last hidden state ----------------------------
    out = jnp.dot(h.astype(MXU_DTYPE), w_fc_ref[...].astype(MXU_DTYPE),
                  preferred_element_type=jnp.float32)
    out_ref[...] = out + b_ref[3:4, 0:C]


# --------------------------------------------------------------------------
# Wrapper: fuse/transpose weights, pack biases, call the kernel (6 operands).
# --------------------------------------------------------------------------
def fuse_params(p):
    A = p["wq"].shape[0]
    H = p["w_hr"].shape[0]
    C = p["wfc"].shape[0]

    # (in, out) layout, gate order r|z|n matching PyTorch GRU.
    w_qkv = jnp.concatenate([p["wq"].T, p["wk"].T, p["wv"].T], axis=1)      # (D, 3A)
    w_ih = jnp.concatenate([p["w_ir"].T, p["w_iz"].T, p["w_in"].T], axis=1)  # (A, 3H)
    w_hh = jnp.concatenate([p["w_hr"].T, p["w_hz"].T, p["w_hn"].T], axis=1)  # (H, 3H)
    w_fc = p["wfc"].T                                                        # (H, C)

    b_qkv = jnp.concatenate([p["bq"], p["bk"], p["bv"]], axis=1)[0]          # (3A,)
    b_ih = jnp.concatenate([p["b_ir"] + p["b_hr"],
                            p["b_iz"] + p["b_hz"],
                            p["b_in"]], axis=1)[0]                           # (3H,)

    W = max(3 * A, 3 * H, H, C)
    biases = jnp.zeros((4, W), jnp.float32)
    biases = biases.at[0, :3 * A].set(b_qkv)
    biases = biases.at[1, :3 * H].set(b_ih)
    biases = biases.at[2, :H].set(p["b_hn"][0])
    biases = biases.at[3, :C].set(p["bfc"][0])
    return w_qkv, w_ih, w_hh, w_fc, biases


def attention_rnn_forward(x, params):
    B = x.shape[0]
    C = params["wfc"].shape[0]
    w_qkv, w_ih, w_hh, w_fc, biases = fuse_params(params)
    vmem = pl.BlockSpec(memory_space=pltpu.MemorySpace.VMEM)
    return pl.pallas_call(
        attn_rnn_kernel,
        out_shape=jax.ShapeDtypeStruct((B, C), jnp.float32),
        in_specs=[vmem] * 6,
        out_specs=vmem,
    )(x, w_qkv, w_ih, w_hh, w_fc, biases)


# --------------------------------------------------------------------------
# Deterministic parameter init (PyTorch-style uniform(-1/sqrt(fan_in), ...))
# Kept in PyTorch (out, in) layout; fusion happens in fuse_params.
# --------------------------------------------------------------------------
def init_params(key, input_dim, attention_dim, hidden, num_classes):
    keys = iter(jax.random.split(key, 32))

    def u(shape, fan_in):
        b = 1.0 / (fan_in ** 0.5)
        return jax.random.uniform(next(keys), shape, jnp.float32, -b, b)

    p = {}
    for nm in ("q", "k", "v"):
        p[f"w{nm}"] = u((attention_dim, input_dim), input_dim)
        p[f"b{nm}"] = u((1, attention_dim), input_dim)
    for g in ("r", "z", "n"):
        p[f"w_i{g}"] = u((hidden, attention_dim), hidden)
        p[f"w_h{g}"] = u((hidden, hidden), hidden)
        p[f"b_i{g}"] = u((1, hidden), hidden)
        p[f"b_h{g}"] = u((1, hidden), hidden)
    p["wfc"] = u((num_classes, hidden), hidden)
    p["bfc"] = u((1, num_classes), hidden)
    return p


# --------------------------------------------------------------------------
# Pure-JAX f32 reference (mirrors the PyTorch forward, unfused weights)
# --------------------------------------------------------------------------
def reference_forward(x, p):
    A = p["wq"].shape[0]
    Q = x @ p["wq"].T + p["bq"].reshape(-1)
    K = x @ p["wk"].T + p["bk"].reshape(-1)
    V = x @ p["wv"].T + p["bv"].reshape(-1)
    scores = (Q @ jnp.swapaxes(K, -2, -1)) / jnp.sqrt(jnp.float32(A))
    w = jax.nn.softmax(scores, axis=-1)
    attn = w @ V                                        # (B, T, A)

    B, T, _ = attn.shape
    H = p["w_hr"].shape[0]
    h = jnp.zeros((B, H), jnp.float32)
    for t in range(T):
        xt = attn[:, t, :]
        r = jax.nn.sigmoid(xt @ p["w_ir"].T + p["b_ir"].reshape(-1)
                           + h @ p["w_hr"].T + p["b_hr"].reshape(-1))
        z = jax.nn.sigmoid(xt @ p["w_iz"].T + p["b_iz"].reshape(-1)
                           + h @ p["w_hz"].T + p["b_hz"].reshape(-1))
        n = jnp.tanh(xt @ p["w_in"].T + p["b_in"].reshape(-1)
                     + r * (h @ p["w_hn"].T + p["b_hn"].reshape(-1)))
        h = (1.0 - z) * n + z * h
    return h @ p["wfc"].T + p["bfc"].reshape(-1)


if __name__ == "__main__":
    B, T = 2, 8                       # batch, sequence length
    input_dim, attention_dim = 16, 32
    rnn_hidden, num_classes = 32, 4

    root = jax.random.PRNGKey(0)
    kx, kp = jax.random.split(root)
    x = jax.random.normal(kx, (B, T, input_dim), jnp.float32)
    params = init_params(kp, input_dim, attention_dim, rnn_hidden, num_classes)

    out = attention_rnn_forward(x, params)
    out = jax.block_until_ready(out)
    assert out.shape == (B, num_classes), out.shape

    ref = reference_forward(x, params)
    # tolerance slightly loosened vs a pure-f32 kernel: MXU inputs are bf16
    # (f32 accumulation), and the GRU recurrence compounds rounding over T=8.
    if not jnp.allclose(out, ref, rtol=3e-2, atol=3e-2):
        raise AssertionError(f"kernel/reference mismatch:\n{out}\n{ref}")

    print("KERNEL_OK")
</pallas_src>

<mosaic_0001>
module attributes {stable_mosaic.version = 11 : i64} {
  func.func @attn_rnn_kernel(%arg0: memref<2x8x16xf32, #tpu.memory_space<vmem>>, %arg1: memref<16x96xf32, #tpu.memory_space<vmem>>, %arg2: memref<32x96xf32, #tpu.memory_space<vmem>>, %arg3: memref<32x96xf32, #tpu.memory_space<vmem>>, %arg4: memref<32x4xf32, #tpu.memory_space<vmem>>, %arg5: memref<4x96xf32, #tpu.memory_space<vmem>>, %arg6: memref<2x4xf32, #tpu.memory_space<vmem>>) attributes {dimension_semantics = [], scalar_prefetch = 0 : i64, scratch_operands = 0 : i64, tpu.core_type = #tpu.core_type<tc>} {
    %c0 = arith.constant 0 : index
    %c0_0 = arith.constant 0 : index
    %c0_1 = arith.constant 0 : index
    %0 = vector.load %arg0[%c0, %c0_0, %c0_1] : memref<2x8x16xf32, #tpu.memory_space<vmem>>, vector<2x8x16xf32>
    %1 = arith.truncf %0 : vector<2x8x16xf32> to vector<2x8x16xbf16>
    %c0_2 = arith.constant 0 : index
    %c0_3 = arith.constant 0 : index
    %2 = vector.load %arg1[%c0_2, %c0_3] : memref<16x96xf32, #tpu.memory_space<vmem>>, vector<16x96xf32>
    %3 = arith.truncf %2 : vector<16x96xf32> to vector<16x96xbf16>
    "tpu.trace_start"() <{level = 10 : i32, message = "btd,da->bta"}> : () -> ()
    %cst = arith.constant dense<0.000000e+00> : vector<2x8x96xf32>
    %4 = tpu.matmul %1, %3, %cst {dimension_numbers = #tpu.dot_dimension_numbers<[2], [0], [0, 1], [1], [0, 0, 0, 1, 1, 1], [], []>} : vector<2x8x16xbf16>, vector<16x96xbf16>, vector<2x8x96xf32> -> vector<2x8x96xf32>
    "tpu.trace_stop"() : () -> ()
    %c0_4 = arith.constant 0 : index
    %c0_5 = arith.constant 0 : index
    %5 = vector.load %arg5[%c0_4, %c0_5] : memref<4x96xf32, #tpu.memory_space<vmem>>, vector<1x96xf32>
    %6 = vector.shape_cast %5 : vector<1x96xf32> to vector<1x1x96xf32>
    %7 = vector.broadcast %6 : vector<1x1x96xf32> to vector<2x8x96xf32>
    %8 = arith.addf %4, %7 : vector<2x8x96xf32>
    %9 = vector.extract_strided_slice %8 {offsets = [0, 0, 0], sizes = [2, 8, 32], strides = [1, 1, 1]} : vector<2x8x96xf32> to vector<2x8x32xf32>
    %10 = vector.extract_strided_slice %8 {offsets = [0, 0, 32], sizes = [2, 8, 32], strides = [1, 1, 1]} : vector<2x8x96xf32> to vector<2x8x32xf32>
    %11 = vector.extract_strided_slice %8 {offsets = [0, 0, 64], sizes = [2, 8, 32], strides = [1, 1, 1]} : vector<2x8x96xf32> to vector<2x8x32xf32>
    %12 = arith.truncf %9 : vector<2x8x32xf32> to vector<2x8x32xbf16>
    %13 = arith.truncf %10 : vector<2x8x32xf32> to vector<2x8x32xbf16>
    "tpu.trace_start"() <{level = 10 : i32, message = "bta,bsa->bts"}> : () -> ()
    %cst_6 = arith.constant dense<0.000000e+00> : vector<2x8x8xf32>
    %14 = tpu.matmul %12, %13, %cst_6 {dimension_numbers = #tpu.dot_dimension_numbers<[2], [2], [1], [1], [0, 0, 0, 1, 1, 1], [0], [0]>} : vector<2x8x32xbf16>, vector<2x8x32xbf16>, vector<2x8x8xf32> -> vector<2x8x8xf32>
    "tpu.trace_stop"() : () -> ()
    %cst_7 = arith.constant 0.176776692 : f32
    %15 = vector.broadcast %cst_7 : f32 to vector<2x8x8xf32>
    %16 = arith.mulf %14, %15 : vector<2x8x8xf32>
    %cst_8 = arith.constant dense<0xFF800000> : vector<2x8xf32>
    %17 = vector.multi_reduction <maximumf>, %16, %cst_8 [2] : vector<2x8x8xf32> to vector<2x8xf32>
    %18 = vector.shape_cast %17 : vector<2x8xf32> to vector<2x8x1xf32>
    %19 = vector.broadcast %18 : vector<2x8x1xf32> to vector<2x8x8xf32>
    %20 = arith.subf %16, %19 : vector<2x8x8xf32>
    %21 = math.exp %20 : vector<2x8x8xf32>
    %cst_9 = arith.constant dense<0.000000e+00> : vector<2x8xf32>
    %22 = vector.multi_reduction <add>, %21, %cst_9 [2] : vector<2x8x8xf32> to vector<2x8xf32>
    %23 = vector.shape_cast %22 : vector<2x8xf32> to vector<2x8x1xf32>
    %24 = tpu.reciprocal %23 {approx = true} : vector<2x8x1xf32> -> vector<2x8x1xf32>
    %25 = vector.broadcast %24 : vector<2x8x1xf32> to vector<2x8x8xf32>
    %26 = arith.mulf %21, %25 : vector<2x8x8xf32>
    %27 = arith.truncf %26 : vector<2x8x8xf32> to vector<2x8x8xbf16>
    %28 = arith.truncf %11 : vector<2x8x32xf32> to vector<2x8x32xbf16>
    "tpu.trace_start"() <{level = 10 : i32, message = "bts,bsa->bta"}> : () -> ()
    %cst_10 = arith.constant dense<0.000000e+00> : vector<2x8x32xf32>
    %29 = tpu.matmul %27, %28, %cst_10 {dimension_numbers = #tpu.dot_dimension_numbers<[2], [1], [1], [2], [0, 0, 0, 1, 1, 2], [0], [0]>} : vector<2x8x8xbf16>, vector<2x8x32xbf16>, vector<2x8x32xf32> -> vector<2x8x32xf32>
    "tpu.trace_stop"() : () -> ()
    %30 = arith.truncf %29 : vector<2x8x32xf32> to vector<2x8x32xbf16>
    %c0_11 = arith.constant 0 : index
    %c0_12 = arith.constant 0 : index
    %31 = vector.load %arg2[%c0_11, %c0_12] : memref<32x96xf32, #tpu.memory_space<vmem>>, vector<32x96xf32>
    %32 = arith.truncf %31 : vector<32x96xf32> to vector<32x96xbf16>
    "tpu.trace_start"() <{level = 10 : i32, message = "bta,ah->bth"}> : () -> ()
    %cst_13 = arith.constant dense<0.000000e+00> : vector<2x8x96xf32>
    %33 = tpu.matmul %30, %32, %cst_13 {dimension_numbers = #tpu.dot_dimension_numbers<[2], [0], [0, 1], [1], [0, 0, 0, 1, 1, 1], [], []>} : vector<2x8x32xbf16>, vector<32x96xbf16>, vector<2x8x96xf32> -> vector<2x8x96xf32>
    "tpu.trace_stop"() : () -> ()
    %c1 = arith.constant 1 : index
    %c0_14 = arith.constant 0 : index
    %34 = vector.load %arg5[%c1, %c0_14] : memref<4x96xf32, #tpu.memory_space<vmem>>, vector<1x96xf32>
    %35 = vector.shape_cast %34 : vector<1x96xf32> to vector<1x1x96xf32>
    %36 = vector.broadcast %35 : vector<1x1x96xf32> to vector<2x8x96xf32>
    %37 = arith.addf %33, %36 : vector<2x8x96xf32>
    %c0_15 = arith.constant 0 : index
    %c0_16 = arith.constant 0 : index
    %38 = vector.load %arg3[%c0_15, %c0_16] : memref<32x96xf32, #tpu.memory_space<vmem>>, vector<32x96xf32>
    %39 = arith.truncf %38 : vector<32x96xf32> to vector<32x96xbf16>
    %c2 = arith.constant 2 : index
    %c0_17 = arith.constant 0 : index
    %40 = vector.load %arg5[%c2, %c0_17] : memref<4x96xf32, #tpu.memory_space<vmem>>, vector<1x32xf32>
    %41 = vector.shape_cast %40 : vector<1x32xf32> to vector<1x32xf32>
    %42 = vector.broadcast %41 : vector<1x32xf32> to vector<2x32xf32>
    %cst_18 = arith.constant 0.000000e+00 : f32
    %43 = vector.broadcast %cst_18 : f32 to vector<2x32xf32>
    %44 = arith.truncf %43 : vector<2x32xf32> to vector<2x32xbf16>
    %cst_19 = arith.constant dense<0.000000e+00> : vector<2x96xf32>
    %45 = tpu.matmul %44, %39, %cst_19 {dimension_numbers = #tpu.dot_dimension_numbers<[1], [0], [0], [1], [0, 0, 1, 1], [], []>} : vector<2x32xbf16>, vector<32x96xbf16>, vector<2x96xf32> -> vector<2x96xf32>
    %46 = vector.extract_strided_slice %37 {offsets = [0, 0, 0], sizes = [2, 1, 96], strides = [1, 1, 1]} : vector<2x8x96xf32> to vector<2x1x96xf32>
    %47 = vector.shape_cast %46 : vector<2x1x96xf32> to vector<2x96xf32>
    %48 = vector.extract_strided_slice %47 {offsets = [0, 0], sizes = [2, 32], strides = [1, 1]} : vector<2x96xf32> to vector<2x32xf32>
    %49 = vector.extract_strided_slice %45 {offsets = [0, 0], sizes = [2, 32], strides = [1, 1]} : vector<2x96xf32> to vector<2x32xf32>
    %50 = arith.addf %48, %49 : vector<2x32xf32>
    %51 = arith.negf %50 : vector<2x32xf32>
    %52 = math.exp %51 : vector<2x32xf32>
    %cst_20 = arith.constant 1.000000e+00 : f32
    %53 = vector.broadcast %cst_20 : f32 to vector<2x32xf32>
    %54 = arith.addf %53, %52 : vector<2x32xf32>
    %55 = arith.divf %53, %54 : vector<2x32xf32>
    %56 = vector.extract_strided_slice %47 {offsets = [0, 32], sizes = [2, 32], strides = [1, 1]} : vector<2x96xf32> to vector<2x32xf32>
    %57 = vector.extract_strided_slice %45 {offsets = [0, 32], sizes = [2, 32], strides = [1, 1]} : vector<2x96xf32> to vector<2x32xf32>
    %58 = arith.addf %56, %57 : vector<2x32xf32>
    %59 = arith.negf %58 : vector<2x32xf32>
    %60 = math.exp %59 : vector<2x32xf32>
    %cst_21 = arith.constant 1.000000e+00 : f32
    %61 = vector.broadcast %cst_21 : f32 to vector<2x32xf32>
    %62 = arith.addf %61, %60 : vector<2x32xf32>
    %63 = arith.divf %61, %62 : vector<2x32xf32>
    %64 = vector.extract_strided_slice %47 {offsets = [0, 64], sizes = [2, 32], strides = [1, 1]} : vector<2x96xf32> to vector<2x32xf32>
    %65 = vector.extract_strided_slice %45 {offsets = [0, 64], sizes = [2, 32], strides = [1, 1]} : vector<2x96xf32> to vector<2x32xf32>
    %66 = arith.addf %65, %42 : vector<2x32xf32>
    %67 = arith.mulf %55, %66 : vector<2x32xf32>
    %68 = arith.addf %64, %67 : vector<2x32xf32>
    %69 = math.tanh %68 : vector<2x32xf32>
    %cst_22 = arith.constant 1.000000e+00 : f32
    %70 = vector.broadcast %cst_22 : f32 to vector<2x32xf32>
    %71 = arith.subf %70, %63 : vector<2x32xf32>
    %72 = arith.mulf %71, %69 : vector<2x32xf32>
    %73 = arith.mulf %63, %43 : vector<2x32xf32>
    %74 = arith.addf %72, %73 : vector<2x32xf32>
    %75 = arith.truncf %74 : vector<2x32xf32> to vector<2x32xbf16>
    %cst_23 = arith.constant dense<0.000000e+00> : vector<2x96xf32>
    %76 = tpu.matmul %75, %39, %cst_23 {dimension_numbers = #tpu.dot_dimension_numbers<[1], [0], [0], [1], [0, 0, 1, 1], [], []>} : vector<2x32xbf16>, vector<32x96xbf16>, vector<2x96xf32> -> vector<2x96xf32>
    %77 = vector.extract_strided_slice %37 {offsets = [0, 1, 0], sizes = [2, 1, 96], strides = [1, 1, 1]} : vector<2x8x96xf32> to vector<2x1x96xf32>
    %78 = vector.shape_cast %77 : vector<2x1x96xf32> to vector<2x96xf32>
    %79 = vector.extract_strided_slice %78 {offsets = [0, 0], sizes = [2, 32], strides = [1, 1]} : vector<2x96xf32> to vector<2x32xf32>
    %80 = vector.extract_strided_slice %76 {offsets = [0, 0], sizes = [2, 32], strides = [1, 1]} : vector<2x96xf32> to vector<2x32xf32>
    %81 = arith.addf %79, %80 : vector<2x32xf32>
    %82 = arith.negf %81 : vector<2x32xf32>
    %83 = math.exp %82 : vector<2x32xf32>
    %cst_24 = arith.constant 1.000000e+00 : f32
    %84 = vector.broadcast %cst_24 : f32 to vector<2x32xf32>
    %85 = arith.addf %84, %83 : vector<2x32xf32>
    %86 = arith.divf %84, %85 : vector<2x32xf32>
    %87 = vector.extract_strided_slice %78 {offsets = [0, 32], sizes = [2, 32], strides = [1, 1]} : vector<2x96xf32> to vector<2x32xf32>
    %88 = vector.extract_strided_slice %76 {offsets = [0, 32], sizes = [2, 32], strides = [1, 1]} : vector<2x96xf32> to vector<2x32xf32>
    %89 = arith.addf %87, %88 : vector<2x32xf32>
    %90 = arith.negf %89 : vector<2x32xf32>
    %91 = math.exp %90 : vector<2x32xf32>
    %cst_25 = arith.constant 1.000000e+00 : f32
    %92 = vector.broadcast %cst_25 : f32 to vector<2x32xf32>
    %93 = arith.addf %92, %91 : vector<2x32xf32>
    %94 = arith.divf %92, %93 : vector<2x32xf32>
    %95 = vector.extract_strided_slice %78 {offsets = [0, 64], sizes = [2, 32], strides = [1, 1]} : vector<2x96xf32> to vector<2x32xf32>
    %96 = vector.extract_strided_slice %76 {offsets = [0, 64], sizes = [2, 32], strides = [1, 1]} : vector<2x96xf32> to vector<2x32xf32>
    %97 = arith.addf %96, %42 : vector<2x32xf32>
    %98 = arith.mulf %86, %97 : vector<2x32xf32>
    %99 = arith.addf %95, %98 : vector<2x32xf32>
    %100 = math.tanh %99 : vector<2x32xf32>
    %cst_26 = arith.constant 1.000000e+00 : f32
    %101 = vector.broadcast %cst_26 : f32 to vector<2x32xf32>
    %102 = arith.subf %101, %94 : vector<2x32xf32>
    %103 = arith.mulf %102, %100 : vector<2x32xf32>
    %104 = arith.mulf %94, %74 : vector<2x32xf32>
    %105 = arith.addf %103, %104 : vector<2x32xf32>
    %106 = arith.truncf %105 : vector<2x32xf32> to vector<2x32xbf16>
    %cst_27 = arith.constant dense<0.000000e+00> : vector<2x96xf32>
    %107 = tpu.matmul %106, %39, %cst_27 {dimension_numbers = #tpu.dot_dimension_numbers<[1], [0], [0], [1], [0, 0, 1, 1], [], []>} : vector<2x32xbf16>, vector<32x96xbf16>, vector<2x96xf32> -> vector<2x96xf32>
    %108 = vector.extract_strided_slice %37 {offsets = [0, 2, 0], sizes = [2, 1, 96], strides = [1, 1, 1]} : vector<2x8x96xf32> to vector<2x1x96xf32>
    %109 = vector.shape_cast %108 : vector<2x1x96xf32> to vector<2x96xf32>
    %110 = vector.extract_strided_slice %109 {offsets = [0, 0], sizes = [2, 32], strides = [1, 1]} : vector<2x96xf32> to vector<2x32xf32>
    %111 = vector.extract_strided_slice %107 {offsets = [0, 0], sizes = [2, 32], strides = [1, 1]} : vector<2x96xf32> to vector<2x32xf32>
    %112 = arith.addf %110, %111 : vector<2x32xf32>
    %113 = arith.negf %112 : vector<2x32xf32>
    %114 = math.exp %113 : vector<2x32xf32>
    %cst_28 = arith.constant 1.000000e+00 : f32
    %115 = vector.broadcast %cst_28 : f32 to vector<2x32xf32>
    %116 = arith.addf %115, %114 : vector<2x32xf32>
    %117 = arith.divf %115, %116 : vector<2x32xf32>
    %118 = vector.extract_strided_slice %109 {offsets = [0, 32], sizes = [2, 32], strides = [1, 1]} : vector<2x96xf32> to vector<2x32xf32>
    %119 = vector.extract_strided_slice %107 {offsets = [0, 32], sizes = [2, 32], strides = [1, 1]} : vector<2x96xf32> to vector<2x32xf32>
    %120 = arith.addf %118, %119 : vector<2x32xf32>
    %121 = arith.negf %120 : vector<2x32xf32>
    %122 = math.exp %121 : vector<2x32xf32>
    %cst_29 = arith.constant 1.000000e+00 : f32
    %123 = vector.broadcast %cst_29 : f32 to vector<2x32xf32>
    %124 = arith.addf %123, %122 : vector<2x32xf32>
    %125 = arith.divf %123, %124 : vector<2x32xf32>
    %126 = vector.extract_strided_slice %109 {offsets = [0, 64], sizes = [2, 32], strides = [1, 1]} : vector<2x96xf32> to vector<2x32xf32>
    %127 = vector.extract_strided_slice %107 {offsets = [0, 64], sizes = [2, 32], strides = [1, 1]} : vector<2x96xf32> to vector<2x32xf32>
    %128 = arith.addf %127, %42 : vector<2x32xf32>
    %129 = arith.mulf %117, %128 : vector<2x32xf32>
    %130 = arith.addf %126, %129 : vector<2x32xf32>
    %131 = math.tanh %130 : vector<2x32xf32>
    %cst_30 = arith.constant 1.000000e+00 : f32
    %132 = vector.broadcast %cst_30 : f32 to vector<2x32xf32>
    %133 = arith.subf %132, %125 : vector<2x32xf32>
    %134 = arith.mulf %133, %131 : vector<2x32xf32>
    %135 = arith.mulf %125, %105 : vector<2x32xf32>
    %136 = arith.addf %134, %135 : vector<2x32xf32>
    %137 = arith.truncf %136 : vector<2x32xf32> to vector<2x32xbf16>
    %cst_31 = arith.constant dense<0.000000e+00> : vector<2x96xf32>
    %138 = tpu.matmul %137, %39, %cst_31 {dimension_numbers = #tpu.dot_dimension_numbers<[1], [0], [0], [1], [0, 0, 1, 1], [], []>} : vector<2x32xbf16>, vector<32x96xbf16>, vector<2x96xf32> -> vector<2x96xf32>
    %139 = vector.extract_strided_slice %37 {offsets = [0, 3, 0], sizes = [2, 1, 96], strides = [1, 1, 1]} : vector<2x8x96xf32> to vector<2x1x96xf32>
    %140 = vector.shape_cast %139 : vector<2x1x96xf32> to vector<2x96xf32>
    %141 = vector.extract_strided_slice %140 {offsets = [0, 0], sizes = [2, 32], strides = [1, 1]} : vector<2x96xf32> to vector<2x32xf32>
    %142 = vector.extract_strided_slice %138 {offsets = [0, 0], sizes = [2, 32], strides = [1, 1]} : vector<2x96xf32> to vector<2x32xf32>
    %143 = arith.addf %141, %142 : vector<2x32xf32>
    %144 = arith.negf %143 : vector<2x32xf32>
    %145 = math.exp %144 : vector<2x32xf32>
    %cst_32 = arith.constant 1.000000e+00 : f32
    %146 = vector.broadcast %cst_32 : f32 to vector<2x32xf32>
    %147 = arith.addf %146, %145 : vector<2x32xf32>
    %148 = arith.divf %146, %147 : vector<2x32xf32>
    %149 = vector.extract_strided_slice %140 {offsets = [0, 32], sizes = [2, 32], strides = [1, 1]} : vector<2x96xf32> to vector<2x32xf32>
    %150 = vector.extract_strided_slice %138 {offsets = [0, 32], sizes = [2, 32], strides = [1, 1]} : vector<2x96xf32> to vector<2x32xf32>
    %151 = arith.addf %149, %150 : vector<2x32xf32>
    %152 = arith.negf %151 : vector<2x32xf32>
    %153 = math.exp %152 : vector<2x32xf32>
    %cst_33 = arith.constant 1.000000e+00 : f32
    %154 = vector.broadcast %cst_33 : f32 to vector<2x32xf32>
    %155 = arith.addf %154, %153 : vector<2x32xf32>
    %156 = arith.divf %154, %155 : vector<2x32xf32>
    %157 = vector.extract_strided_slice %140 {offsets = [0, 64], sizes = [2, 32], strides = [1, 1]} : vector<2x96xf32> to vector<2x32xf32>
    %158 = vector.extract_strided_slice %138 {offsets = [0, 64], sizes = [2, 32], strides = [1, 1]} : vector<2x96xf32> to vector<2x32xf32>
    %159 = arith.addf %158, %42 : vector<2x32xf32>
    %160 = arith.mulf %148, %159 : vector<2x32xf32>
    %161 = arith.addf %157, %160 : vector<2x32xf32>
    %162 = math.tanh %161 : vector<2x32xf32>
    %cst_34 = arith.constant 1.000000e+00 : f32
    %163 = vector.broadcast %cst_34 : f32 to vector<2x32xf32>
    %164 = arith.subf %163, %156 : vector<2x32xf32>
    %165 = arith.mulf %164, %162 : vector<2x32xf32>
    %166 = arith.mulf %156, %136 : vector<2x32xf32>
    %167 = arith.addf %165, %166 : vector<2x32xf32>
    %168 = arith.truncf %167 : vector<2x32xf32> to vector<2x32xbf16>
    %cst_35 = arith.constant dense<0.000000e+00> : vector<2x96xf32>
    %169 = tpu.matmul %168, %39, %cst_35 {dimension_numbers = #tpu.dot_dimension_numbers<[1], [0], [0], [1], [0, 0, 1, 1], [], []>} : vector<2x32xbf16>, vector<32x96xbf16>, vector<2x96xf32> -> vector<2x96xf32>
    %170 = vector.extract_strided_slice %37 {offsets = [0, 4, 0], sizes = [2, 1, 96], strides = [1, 1, 1]} : vector<2x8x96xf32> to vector<2x1x96xf32>
    %171 = vector.shape_cast %170 : vector<2x1x96xf32> to vector<2x96xf32>
    %172 = vector.extract_strided_slice %171 {offsets = [0, 0], sizes = [2, 32], strides = [1, 1]} : vector<2x96xf32> to vector<2x32xf32>
    %173 = vector.extract_strided_slice %169 {offsets = [0, 0], sizes = [2, 32], strides = [1, 1]} : vector<2x96xf32> to vector<2x32xf32>
    %174 = arith.addf %172, %173 : vector<2x32xf32>
    %175 = arith.negf %174 : vector<2x32xf32>
    %176 = math.exp %175 : vector<2x32xf32>
    %cst_36 = arith.constant 1.000000e+00 : f32
    %177 = vector.broadcast %cst_36 : f32 to vector<2x32xf32>
    %178 = arith.addf %177, %176 : vector<2x32xf32>
    %179 = arith.divf %177, %178 : vector<2x32xf32>
    %180 = vector.extract_strided_slice %171 {offsets = [0, 32], sizes = [2, 32], strides = [1, 1]} : vector<2x96xf32> to vector<2x32xf32>
    %181 = vector.extract_strided_slice %169 {offsets = [0, 32], sizes = [2, 32], strides = [1, 1]} : vector<2x96xf32> to vector<2x32xf32>
    %182 = arith.addf %180, %181 : vector<2x32xf32>
    %183 = arith.negf %182 : vector<2x32xf32>
    %184 = math.exp %183 : vector<2x32xf32>
    %cst_37 = arith.constant 1.000000e+00 : f32
    %185 = vector.broadcast %cst_37 : f32 to vector<2x32xf32>
    %186 = arith.addf %185, %184 : vector<2x32xf32>
    %187 = arith.divf %185, %186 : vector<2x32xf32>
    %188 = vector.extract_strided_slice %171 {offsets = [0, 64], sizes = [2, 32], strides = [1, 1]} : vector<2x96xf32> to vector<2x32xf32>
    %189 = vector.extract_strided_slice %169 {offsets = [0, 64], sizes = [2, 32], strides = [1, 1]} : vector<2x96xf32> to vector<2x32xf32>
    %190 = arith.addf %189, %42 : vector<2x32xf32>
    %191 = arith.mulf %179, %190 : vector<2x32xf32>
    %192 = arith.addf %188, %191 : vector<2x32xf32>
    %193 = math.tanh %192 : vector<2x32xf32>
    %cst_38 = arith.constant 1.000000e+00 : f32
    %194 = vector.broadcast %cst_38 : f32 to vector<2x32xf32>
    %195 = arith.subf %194, %187 : vector<2x32xf32>
    %196 = arith.mulf %195, %193 : vector<2x32xf32>
    %197 = arith.mulf %187, %167 : vector<2x32xf32>
    %198 = arith.addf %196, %197 : vector<2x32xf32>
    %199 = arith.truncf %198 : vector<2x32xf32> to vector<2x32xbf16>
    %cst_39 = arith.constant dense<0.000000e+00> : vector<2x96xf32>
    %200 = tpu.matmul %199, %39, %cst_39 {dimension_numbers = #tpu.dot_dimension_numbers<[1], [0], [0], [1], [0, 0, 1, 1], [], []>} : vector<2x32xbf16>, vector<32x96xbf16>, vector<2x96xf32> -> vector<2x96xf32>
    %201 = vector.extract_strided_slice %37 {offsets = [0, 5, 0], sizes = [2, 1, 96], strides = [1, 1, 1]} : vector<2x8x96xf32> to vector<2x1x96xf32>
    %202 = vector.shape_cast %201 : vector<2x1x96xf32> to vector<2x96xf32>
    %203 = vector.extract_strided_slice %202 {offsets = [0, 0], sizes = [2, 32], strides = [1, 1]} : vector<2x96xf32> to vector<2x32xf32>
    %204 = vector.extract_strided_slice %200 {offsets = [0, 0], sizes = [2, 32], strides = [1, 1]} : vector<2x96xf32> to vector<2x32xf32>
    %205 = arith.addf %203, %204 : vector<2x32xf32>
    %206 = arith.negf %205 : vector<2x32xf32>
    %207 = math.exp %206 : vector<2x32xf32>
    %cst_40 = arith.constant 1.000000e+00 : f32
    %208 = vector.broadcast %cst_40 : f32 to vector<2x32xf32>
    %209 = arith.addf %208, %207 : vector<2x32xf32>
    %210 = arith.divf %208, %209 : vector<2x32xf32>
    %211 = vector.extract_strided_slice %202 {offsets = [0, 32], sizes = [2, 32], strides = [1, 1]} : vector<2x96xf32> to vector<2x32xf32>
    %212 = vector.extract_strided_slice %200 {offsets = [0, 32], sizes = [2, 32], strides = [1, 1]} : vector<2x96xf32> to vector<2x32xf32>
    %213 = arith.addf %211, %212 : vector<2x32xf32>
    %214 = arith.negf %213 : vector<2x32xf32>
    %215 = math.exp %214 : vector<2x32xf32>
    %cst_41 = arith.constant 1.000000e+00 : f32
    %216 = vector.broadcast %cst_41 : f32 to vector<2x32xf32>
    %217 = arith.addf %216, %215 : vector<2x32xf32>
    %218 = arith.divf %216, %217 : vector<2x32xf32>
    %219 = vector.extract_strided_slice %202 {offsets = [0, 64], sizes = [2, 32], strides = [1, 1]} : vector<2x96xf32> to vector<2x32xf32>
    %220 = vector.extract_strided_slice %200 {offsets = [0, 64], sizes = [2, 32], strides = [1, 1]} : vector<2x96xf32> to vector<2x32xf32>
    %221 = arith.addf %220, %42 : vector<2x32xf32>
    %222 = arith.mulf %210, %221 : vector<2x32xf32>
    %223 = arith.addf %219, %222 : vector<2x32xf32>
    %224 = math.tanh %223 : vector<2x32xf32>
    %cst_42 = arith.constant 1.000000e+00 : f32
    %225 = vector.broadcast %cst_42 : f32 to vector<2x32xf32>
    %226 = arith.subf %225, %218 : vector<2x32xf32>
    %227 = arith.mulf %226, %224 : vector<2x32xf32>
    %228 = arith.mulf %218, %198 : vector<2x32xf32>
    %229 = arith.addf %227, %228 : vector<2x32xf32>
    %230 = arith.truncf %229 : vector<2x32xf32> to vector<2x32xbf16>
    %cst_43 = arith.constant dense<0.000000e+00> : vector<2x96xf32>
    %231 = tpu.matmul %230, %39, %cst_43 {dimension_numbers = #tpu.dot_dimension_numbers<[1], [0], [0], [1], [0, 0, 1, 1], [], []>} : vector<2x32xbf16>, vector<32x96xbf16>, vector<2x96xf32> -> vector<2x96xf32>
    %232 = vector.extract_strided_slice %37 {offsets = [0, 6, 0], sizes = [2, 1, 96], strides = [1, 1, 1]} : vector<2x8x96xf32> to vector<2x1x96xf32>
    %233 = vector.shape_cast %232 : vector<2x1x96xf32> to vector<2x96xf32>
    %234 = vector.extract_strided_slice %233 {offsets = [0, 0], sizes = [2, 32], strides = [1, 1]} : vector<2x96xf32> to vector<2x32xf32>
    %235 = vector.extract_strided_slice %231 {offsets = [0, 0], sizes = [2, 32], strides = [1, 1]} : vector<2x96xf32> to vector<2x32xf32>
    %236 = arith.addf %234, %235 : vector<2x32xf32>
    %237 = arith.negf %236 : vector<2x32xf32>
    %238 = math.exp %237 : vector<2x32xf32>
    %cst_44 = arith.constant 1.000000e+00 : f32
    %239 = vector.broadcast %cst_44 : f32 to vector<2x32xf32>
    %240 = arith.addf %239, %238 : vector<2x32xf32>
    %241 = arith.divf %239, %240 : vector<2x32xf32>
    %242 = vector.extract_strided_slice %233 {offsets = [0, 32], sizes = [2, 32], strides = [1, 1]} : vector<2x96xf32> to vector<2x32xf32>
    %243 = vector.extract_strided_slice %231 {offsets = [0, 32], sizes = [2, 32], strides = [1, 1]} : vector<2x96xf32> to vector<2x32xf32>
    %244 = arith.addf %242, %243 : vector<2x32xf32>
    %245 = arith.negf %244 : vector<2x32xf32>
    %246 = math.exp %245 : vector<2x32xf32>
    %cst_45 = arith.constant 1.000000e+00 : f32
    %247 = vector.broadcast %cst_45 : f32 to vector<2x32xf32>
    %248 = arith.addf %247, %246 : vector<2x32xf32>
    %249 = arith.divf %247, %248 : vector<2x32xf32>
    %250 = vector.extract_strided_slice %233 {offsets = [0, 64], sizes = [2, 32], strides = [1, 1]} : vector<2x96xf32> to vector<2x32xf32>
    %251 = vector.extract_strided_slice %231 {offsets = [0, 64], sizes = [2, 32], strides = [1, 1]} : vector<2x96xf32> to vector<2x32xf32>
    %252 = arith.addf %251, %42 : vector<2x32xf32>
    %253 = arith.mulf %241, %252 : vector<2x32xf32>
    %254 = arith.addf %250, %253 : vector<2x32xf32>
    %255 = math.tanh %254 : vector<2x32xf32>
    %cst_46 = arith.constant 1.000000e+00 : f32
    %256 = vector.broadcast %cst_46 : f32 to vector<2x32xf32>
    %257 = arith.subf %256, %249 : vector<2x32xf32>
    %258 = arith.mulf %257, %255 : vector<2x32xf32>
    %259 = arith.mulf %249, %229 : vector<2x32xf32>
    %260 = arith.addf %258, %259 : vector<2x32xf32>
    %261 = arith.truncf %260 : vector<2x32xf32> to vector<2x32xbf16>
    %cst_47 = arith.constant dense<0.000000e+00> : vector<2x96xf32>
    %262 = tpu.matmul %261, %39, %cst_47 {dimension_numbers = #tpu.dot_dimension_numbers<[1], [0], [0], [1], [0, 0, 1, 1], [], []>} : vector<2x32xbf16>, vector<32x96xbf16>, vector<2x96xf32> -> vector<2x96xf32>
    %263 = vector.extract_strided_slice %37 {offsets = [0, 7, 0], sizes = [2, 1, 96], strides = [1, 1, 1]} : vector<2x8x96xf32> to vector<2x1x96xf32>
    %264 = vector.shape_cast %263 : vector<2x1x96xf32> to vector<2x96xf32>
    %265 = vector.extract_strided_slice %264 {offsets = [0, 0], sizes = [2, 32], strides = [1, 1]} : vector<2x96xf32> to vector<2x32xf32>
    %266 = vector.extract_strided_slice %262 {offsets = [0, 0], sizes = [2, 32], strides = [1, 1]} : vector<2x96xf32> to vector<2x32xf32>
    %267 = arith.addf %265, %266 : vector<2x32xf32>
    %268 = arith.negf %267 : vector<2x32xf32>
    %269 = math.exp %268 : vector<2x32xf32>
    %cst_48 = arith.constant 1.000000e+00 : f32
    %270 = vector.broadcast %cst_48 : f32 to vector<2x32xf32>
    %271 = arith.addf %270, %269 : vector<2x32xf32>
    %272 = arith.divf %270, %271 : vector<2x32xf32>
    %273 = vector.extract_strided_slice %264 {offsets = [0, 32], sizes = [2, 32], strides = [1, 1]} : vector<2x96xf32> to vector<2x32xf32>
    %274 = vector.extract_strided_slice %262 {offsets = [0, 32], sizes = [2, 32], strides = [1, 1]} : vector<2x96xf32> to vector<2x32xf32>
    %275 = arith.addf %273, %274 : vector<2x32xf32>
    %276 = arith.negf %275 : vector<2x32xf32>
    %277 = math.exp %276 : vector<2x32xf32>
    %cst_49 = arith.constant 1.000000e+00 : f32
    %278 = vector.broadcast %cst_49 : f32 to vector<2x32xf32>
    %279 = arith.addf %278, %277 : vector<2x32xf32>
    %280 = arith.divf %278, %279 : vector<2x32xf32>
    %281 = vector.extract_strided_slice %264 {offsets = [0, 64], sizes = [2, 32], strides = [1, 1]} : vector<2x96xf32> to vector<2x32xf32>
    %282 = vector.extract_strided_slice %262 {offsets = [0, 64], sizes = [2, 32], strides = [1, 1]} : vector<2x96xf32> to vector<2x32xf32>
    %283 = arith.addf %282, %42 : vector<2x32xf32>
    %284 = arith.mulf %272, %283 : vector<2x32xf32>
    %285 = arith.addf %281, %284 : vector<2x32xf32>
    %286 = math.tanh %285 : vector<2x32xf32>
    %cst_50 = arith.constant 1.000000e+00 : f32
    %287 = vector.broadcast %cst_50 : f32 to vector<2x32xf32>
    %288 = arith.subf %287, %280 : vector<2x32xf32>
    %289 = arith.mulf %288, %286 : vector<2x32xf32>
    %290 = arith.mulf %280, %260 : vector<2x32xf32>
    %291 = arith.addf %289, %290 : vector<2x32xf32>
    %292 = arith.truncf %291 : vector<2x32xf32> to vector<2x32xbf16>
    %c0_51 = arith.constant 0 : index
    %c0_52 = arith.constant 0 : index
    %293 = vector.load %arg4[%c0_51, %c0_52] : memref<32x4xf32, #tpu.memory_space<vmem>>, vector<32x4xf32>
    %294 = arith.truncf %293 : vector<32x4xf32> to vector<32x4xbf16>
    %cst_53 = arith.constant dense<0.000000e+00> : vector<2x4xf32>
    %295 = tpu.matmul %292, %294, %cst_53 {dimension_numbers = #tpu.dot_dimension_numbers<[1], [0], [0], [1], [0, 0, 1, 1], [], []>} : vector<2x32xbf16>, vector<32x4xbf16>, vector<2x4xf32> -> vector<2x4xf32>
    %c3 = arith.constant 3 : index
    %c0_54 = arith.constant 0 : index
    %296 = vector.load %arg5[%c3, %c0_54] : memref<4x96xf32, #tpu.memory_space<vmem>>, vector<1x4xf32>
    %297 = vector.broadcast %296 : vector<1x4xf32> to vector<2x4xf32>
    %298 = arith.addf %295, %297 : vector<2x4xf32>
    %c0_55 = arith.constant 0 : index
    %c0_56 = arith.constant 0 : index
    %299 = vector.load %arg6[%c0_55, %c0_56] : memref<2x4xf32, #tpu.memory_space<vmem>>, vector<2x4xf32>
    tpu.vector_store %arg6[%c0_55, %c0_56], %298 {strides = array<i32>} : memref<2x4xf32, #tpu.memory_space<vmem>>, vector<2x4xf32>,
    return
  }
}

</mosaic_0001>

<bundles_post_ra>
// kernel: tpu_custom_call.1
= control target key start
LH: loop header
LB: loop body
LE: loop exit
PB: predicated region body
PF: predicated region fallthrough
CT: control target
= control target key end

     0   :  { %11 = vsyncpa [#allocation3], 0  ;;  %s2210_s0 = inlined_call_operand.hbm [shape: f32[2,8,16], index: 0, kind: input, shape index: {}]   ;;  %s2211_s1 = inlined_call_operand.hbm [shape: f32[16,96], index: 1, kind: input, shape index: {}]   ;;  %s2212_s2 = inlined_call_operand.vmem [shape: f32[32,96], index: 2, kind: input, shape index: {}]   ;;  %s2213_s3 = inlined_call_operand.hbm [shape: f32[32,96], index: 3, kind: input, shape index: {}]   ;;  %s2214_s4 = inlined_call_operand.vmem [shape: f32[32,4], index: 4, kind: input, shape index: {}]   ;;  %s2215_s5 = inlined_call_operand.vmem [shape: f32[4,96], index: 5, kind: input, shape index: {}]   ;;  %s2216_s6 = inlined_call_operand.hbm [shape: f32[2,4], index: 6, kind: output, shape index: {}]  }
   0x1   :  { %12 = vsyncpa [#allocation6], 0 }
   0x2   :  { %13 = vsyncpa [#allocation4], 0  ;;  %s1840_s21 = smov [#allocation5]   ;;  %s1841_s23 = smov [#allocation2]  }
   0x3   :  { %s31_s22 = sshll.u32 %s1840_s21, 4  ;;  %s19_s24 = sshll.u32 %s1841_s23, 4  ;;  %s32_s22 = int_to_ptr.vmem [resolvable:$true] %s31_s22  ;;  %s20_s24 = int_to_ptr.vmem [resolvable:$true] %s19_s24 }
   0x4   :  { %s1762_s25 = scalar_lea.vmem %s32_s22, 256  ;;  %p1767_p1 = scmp.lt.s32.totalorder %s32_s22, %s32_s22 }
   0x5   :  { %p1763_p0 = scmp.ne.s32.totalorder %s32_s22, %s1762_s25  ;;  %p1768_p2 = scmp.lt.s32.totalorder %s1762_s25, %s1762_s25 }
   0x7   :  { %p1769_p3 = por %p1768_p2, %p1767_p1 }
   0x9   :  { %p1770_p4 = pnand %p1769_p3, %p1763_p0 }
   0xb   :  { %1773 = shalt.err (!%p1770_p4)
}
   0xc   :  { %s1842_s26 = smov 128   ;;  %s1843_s27 = smov 8  }
   0xd   :  { %37 = dma.hbm_to_vmem [thread:$0]  %s2211_s1, 256, %s32_s22, [#allocation6], %s1842_s26, %s1842_s26, %s1843_s27  }
   0xe   :  { %s1782_s30 = scalar_lea.vmem %s20_s24, 256  ;;  %p1787_p6 = scmp.lt.s32.totalorder %s20_s24, %s20_s24 }
   0xf   :  { %p1783_p5 = scmp.ne.s32.totalorder %s20_s24, %s1782_s30  ;;  %p1788_p7 = scmp.lt.s32.totalorder %s1782_s30, %s1782_s30 }
  0x11   :  { %p1789_p8 = por %p1788_p7, %p1787_p6 }
  0x13   :  { %p1790_p9 = pnand %p1789_p8, %p1783_p5 }
  0x15   :  { %1793 = shalt.err (!%p1790_p9)
}
  0x16   :  { %25 = dma.hbm_to_vmem [thread:$0]  %s2210_s0, 256, %s20_s24, [#allocation3], %s1842_s26, %s1842_s26, %s1843_s27  }
  0x17   :  { %s1844_s9 = smov [#allocation7]  }
  0x18   :  { %s45_s10 = sshll.u32 %s1844_s9, 4  ;;  %s46_s10 = int_to_ptr.vmem [resolvable:$true] %s45_s10 }
  0x19   :  { %s1802_s11 = scalar_lea.vmem %s46_s10, 512  ;;  %p1807_p11 = scmp.lt.s32.totalorder %s46_s10, %s46_s10 }
  0x1a   :  { %p1803_p10 = scmp.ne.s32.totalorder %s46_s10, %s1802_s11  ;;  %p1808_p12 = scmp.lt.s32.totalorder %s1802_s11, %s1802_s11 }
  0x1c   :  { %p1809_p13 = por %p1808_p12, %p1807_p11 }
  0x1e   :  { %p1810_p0 = pnand %p1809_p13, %p1803_p10 }
  0x20   :  { %1813 = shalt.err (!%p1810_p0)
}
  0x21   :  { %51 = dma.hbm_to_vmem [thread:$0]  %s2213_s3, 512, %s46_s10, [#allocation6], %s1842_s26, %s1842_s26, %s1843_s27  }
  0x22   :  { %1834 = dma.done.wait [#allocation3], 256  }
  0x23   :  { %1835 = vsyncadd [#allocation3], 4294967040 }
  0x24   :  { %1836 = dma.done.wait [#allocation6], 768  }
  0x25   :  { %1837 = vsyncadd [#allocation6], 4294966528  ;;  %v1845_v0 = vmov 0.0   ;;  %vm1846_vm0 = vmmov 0   ;;  %v70_v1 = vld [vmem:[#allocation5] sm:$0xff]  ;;  %v71_v2 = vld [vmem:[#allocation5 + $0x8] sm:$0xff] }
  0x26   :  { %1529 = vmatprep.subr.bf16.mxu0 %v1845_v0  ;;  %1531 = vmatprep.mubr.msk.bf16.mxu0 %vm1846_vm0, %v1845_v0  ;;  %v66_v3 = vld [vmem:[#allocation2] sm:$0xff]  ;;  %v72_v4 = vpack.c.bf16 %v71_v2, %v70_v1  ;;  %v67_v5 = vld [vmem:[#allocation2 + $0x8] sm:$0xff]  ;;  %vm83_vm1 = vcmask 130048   ;;  %s1847_s13 = smov 96   ;;  %vm133_vm2 = vcmask 261120   ;;  %vm231_vm3 = vcmask 64512  }
  0x27   :  { %1535 = vmatprep.subr.bf16.mxu1 %v1845_v0  ;;  %1537 = vmatprep.mubr.msk.bf16.mxu1 %vm1846_vm0, %v1845_v0  ;;  %v1487_v6 = vpack.c.bf16 %v67_v5, %v66_v3  ;;  %v1451_v7 = vld [vmem:[%s2215_s5] ss:$0 sm:$0xff]  ;;  %s1848_s14 = smov 64   ;;  %vm261_vm4 = vcmask 1043456   ;;  %v417_v51 = vld [vmem:[#allocation7 + $0x10] sm:$0xff]  ;;  %v418_v52 = vld [vmem:[#allocation7 + $0x18] sm:$0xff] }
  0x28   :  { %1530 = vmatpush3.bf16.msra.mxu0 %v72_v4  ;;  %v1930_v55 = vpack.c.bf16 %v418_v52, %v417_v51  ;;  %v415_v57 = vld [vmem:[#allocation7] sm:$0xff]  ;;  %v416_v58 = vld [vmem:[#allocation7 + $0x8] sm:$0xff]  ;;  %v1849_v60 = vmov 0   ;;  %v357_v61 = vld [vmem:[%s2212_s2 + $0x10] sm:$0xff]  ;;  %vm537_vm5 = vcmask 1041409   ;;  %s1850_s11 = smov [#allocation8]  }
  0x29   :  { %1541 = vmatprep.subr.bf16.mxu0 %v1845_v0  ;;  %v1936_v59 = vpack.c.bf16 %v416_v58, %v415_v57  ;;  %v358_v62 = vld [vmem:[%s2212_s2 + $0x18] sm:$0xff]  ;;  %v355_v1 = vld [vmem:[%s2212_s2] sm:$0xff]  ;;  %v356_v2 = vld [vmem:[%s2212_s2 + $0x8] sm:$0xff]  ;;  %s1441_s1 = sshll.u32 %s1850_s11, 4  ;;  %vm1433_vm6 = vcmask 25600   ;;  %s1442_s1 = int_to_ptr.vmem [resolvable:$true] %s1441_s1 }
  0x2a   :  { %v360_v63 = vpack.c.bf16 %v358_v62, %v357_v61  ;;  %v1461_v3 = vld [vmem:[%s2215_s5 + $0x2] ss:$0 sm:$0xff]  ;;  %v359_v4 = vpack.c.bf16 %v356_v2, %v355_v1  ;;  %s1814_s12 = scalar_lea.vmem %s1442_s1, 32  ;;  %p1819_p2 = scmp.lt.s32.totalorder %s1442_s1, %s1442_s1 }
  0x2b   :  { %1532 = vmatmul.mubr.msk.bf16.vlgmr.msra.gmra.mxu0 %vm83_vm1, %v1487_v6  ;;  %p1815_p1 = scmp.ne.s32.totalorder %s1442_s1, %s1814_s12  ;;  %p1820_p3 = scmp.lt.s32.totalorder %s1814_s12, %s1814_s12 }
  0x2c   :  { %1543 = vmatprep.mubr.msk.bf16.mxu0 %vm1846_vm0, %v1845_v0 }
  0x2d   :  { %p1821_p4 = por %p1820_p3, %p1819_p2 }
  0x2f   :  { %p1822_p5 = pnand %p1821_p4, %p1815_p1 }
  0xeb   :  { %v121_v8 = vpop.f32.mrf.mxu0 }
  0xec   :  { %v122_v9 = vadd.f32 %v1451_v7, %v121_v8 }
  0xed   :  { %v1533_v10 = vpop.f32.mrf.mxu0 }
  0xee   :  { %v128_v11 = vpack.c.bf16 %v122_v9, %v122_v9 }
  0xef   :  { %v124_v12 = vpop.f32.mrf.mxu0 }
  0xf0   :  { %v125_v13 = vadd.f32 %v1451_v7, %v124_v12  ;;  %131 = vrot.lane.b32.xlu0 %v128_v11, %s1847_s13 }
  0xf1   :  { %v1534_v14 = vpop.f32.mrf.mxu0 }
  0xf2   :  { %v129_v15 = vpack.c.bf16 %v125_v13, %v125_v13 }
  0xf4   :  { %181 = vrot.lane.b32.xlu0 %v129_v15, %s1847_s13 }
 0x162   :  { %v132_v16 = vpop.permute.xlu0 %131 }
 0x163   :  { %v138_v17 = vsel %vm133_vm2, %v132_v16, 0 }
 0x164   :  { %1536 = vmatpush3.bf16.xpose.msra.mxu1 %v138_v17 }
 0x165   :  { %1547 = vmatprep.subr.bf16.mxu1 %v1845_v0 }
 0x166   :  { %v182_v18 = vpop.permute.xlu0 %181 }
 0x167   :  { %v187_v19 = vsel %vm133_vm2, %v182_v18, 0 }
 0x168   :  { %1542 = vmatpush3.bf16.xpose.msra.mxu0 %v187_v19 }
 0x169   :  { %1553 = vmatprep.subr.bf16.mxu0 %v1845_v0 }
 0x16b   :  { %1538 = vmatmul.mubr.msk.bf16.vlgmr.msra.gmra.mxu1 %vm133_vm2, %v128_v11 }
 0x16c   :  { %1549 = vmatprep.mubr.msk.bf16.mxu1 %vm1846_vm0, %v1845_v0 }
 0x16f   :  { %1544 = vmatmul.mubr.msk.bf16.vlgmr.msra.gmra.mxu0 %vm133_vm2, %v129_v15 }
 0x170   :  { %1555 = vmatprep.mubr.msk.bf16.mxu0 %vm1846_vm0, %v1845_v0 }
 0x22b   :  { %v174_v20 = vpop.f32.mrf.mxu1 }
 0x22c   :  { %v229_v21 = vmul.f32 0.17677669, %v174_v20 }
 0x22d   :  { %v1539_v22 = vpop.f32.mrf.mxu1 }
 0x22e   :  { %v232_v23 = vsel %vm231_vm3, %v229_v21, -inf }
 0x22f   :  { %233 = vmax.xlane.f32.xlu1 %v232_v23  ;;  %v177_v24 = vpop.f32.mrf.mxu1  ;;  %v223_v25 = vpop.f32.mrf.mxu0 }
 0x230   :  { %v230_v26 = vmul.f32 0.17677669, %v223_v25 }
 0x231   :  { %v1540_v27 = vpop.f32.mrf.mxu1  ;;  %v1545_v28 = vpop.f32.mrf.mxu0 }
 0x232   :  { %v235_v29 = vsel %vm231_vm3, %v230_v26, -inf }
 0x233   :  { %236 = vmax.xlane.f32.xlu1 %v235_v29  ;;  %v226_v30 = vpop.f32.mrf.mxu0 }
 0x235   :  { %v1546_v31 = vpop.f32.mrf.mxu0 }
 0x244   :  { %256 = vrot.lane.b32.xlu1 %v128_v11, %s1848_s14 }
 0x2b8   :  { %v234_v32 = vpop.xlane.xlu1 %233 }
 0x2b9   :  { %v238_v33 = vsub.f32 %v229_v21, %v234_v32  ;;  %v1458_v21 = vld [vmem:[%s2215_s5 + $0x1] ss:$0 sm:$0xff] }
 0x2bb   :  { %v240_v34 = vmul.f32 1.442695, %v238_v33 }
 0x2bc   :  { %v237_v35 = vpop.xlane.xlu1 %236 }
 0x2bd   :  { %1650 = vpow2.f32 %v240_v34  ;;  %v239_v36 = vsub.f32 %v230_v26, %v237_v35 }
 0x2bf   :  { %v242_v37 = vmul.f32 1.442695, %v239_v36 }
 0x2c0   :  { %v257_v38 = vpop.permute.xlu1 %256 }
 0x2c1   :  { %1652 = vpow2.f32 %v242_v37  ;;  %v263_v39 = vsel %vm261_vm4, %v257_v38, 0 }
 0x2c2   :  { %1548 = vmatpush3.bf16.msra.mxu1 %v263_v39 }
 0x2c3   :  { %1559 = vmatprep.subr.bf16.mxu1 %v1845_v0 }
 0x2ca   :  { %v1651_v40 = vpop.eup %1650 }
 0x2cb   :  { %v244_v41 = vsel %vm231_vm3, %v1651_v40, 0.0 }
 0x2cc   :  { %245 = vadd.xlane.f32.xlu0 %v244_v41 }
 0x2ce   :  { %v1653_v42 = vpop.eup %1652 }
 0x2cf   :  { %v247_v43 = vsel %vm231_vm3, %v1653_v42, 0.0 }
 0x2d0   :  { %248 = vadd.xlane.f32.xlu1 %v247_v43 }
 0x2e1   :  { %305 = vrot.lane.b32.xlu1 %v129_v15, %s1848_s14 }
 0x2e5   :  { %488 = vrot.lane.b32.xlu1 %v1461_v3, %s1848_s14 }
 0x355   :  { %v246_v44 = vpop.xlane.xlu0 %245 }
 0x356   :  { %1654 = vrcp.f32 %v246_v44 }
 0x359   :  { %v249_v45 = vpop.xlane.xlu1 %248 }
 0x35a   :  { %1656 = vrcp.f32 %v249_v45 }
 0x35d   :  { %v306_v46 = vpop.permute.xlu1 %305 }
 0x35e   :  { %v311_v47 = vsel %vm261_vm4, %v306_v46, 0 }
 0x35f   :  { %1554 = vmatpush3.bf16.msra.mxu0 %v311_v47 }
 0x360   :  { %1567 = vmatprep.subr.bf16.mxu0 %v1845_v0 }
 0x361   :  { %v1972_v14 = vpop.permute.xlu1 %488 }
 0x363   :  { %v1655_v48 = vpop.eup %1654 }
 0x364   :  { %v252_v49 = vmul.f32 %v1655_v48, %v1651_v40 }
 0x366   :  { %v254_v50 = vpack.c.bf16 %v252_v49, %v252_v49 }
 0x367   :  { %v1657_v53 = vpop.eup %1656 }
 0x368   :  { %1550 = vmatmul.mubr.msk.bf16.vlgmr.msra.gmra.mxu1 %vm231_vm3, %v254_v50  ;;  %v253_v54 = vmul.f32 %v1657_v53, %v1653_v42 }
 0x369   :  { %1563 = vmatprep.mubr.msk.bf16.mxu1 %vm1846_vm0, %v1845_v0  ;;  %1560 = vmatpush3.bf16.msra.mxu1 %v360_v63 }
 0x36a   :  { %v255_v56 = vpack.c.bf16 %v253_v54, %v253_v54  ;;  %1561 = vmatprep.subr.bf16.mxu1 %v1845_v0 }
 0x36c   :  { %1556 = vmatmul.mubr.msk.bf16.vlgmr.msra.gmra.mxu0 %vm231_vm3, %v255_v56 }
 0x36d   :  { %1568 = vmatpush3.bf16.msra.mxu0 %v1930_v55  ;;  %1571 = vmatprep.mubr.msk.bf16.mxu0 %vm1846_vm0, %v1845_v0 }
 0x36e   :  { %1569 = vmatprep.subr.bf16.mxu0 %v1845_v0  ;;  %1562 = vmatpush3.bf16.msra.mxu1 %v359_v4 }
 0x36f   :  { %1575 = vmatprep.subr.bf16.mxu1 %v1845_v0 }
 0x371   :  { %1570 = vmatpush3.bf16.msra.mxu0 %v1936_v59 }
 0x372   :  { %1583 = vmatprep.subr.bf16.mxu0 %v1845_v0 }
 0x374   :  { %1572 = vmatmul.mubr.bf16.vlgmr.msra.gmra.mxu0 %v1849_v60 }
 0x375   :  { %1584 = vmatpush3.bf16.msra.mxu0 %v1930_v55  ;;  %1587 = vmatprep.mubr.msk.bf16.mxu0 %vm1846_vm0, %v1845_v0 }
 0x376   :  { %1585 = vmatprep.subr.bf16.mxu0 %v1845_v0 }
 0x379   :  { %1586 = vmatpush3.bf16.msra.mxu0 %v1936_v59 }
 0x37a   :  { %1599 = vmatprep.subr.bf16.mxu0 %v1845_v0 }
 0x428   :  { %v299_v5 = vpop.f32.mrf.mxu1 }
 0x42a   :  { %v1551_v6 = vpop.f32.mrf.mxu1 }
 0x42c   :  { %v302_v7 = vpop.f32.mrf.mxu1  ;;  %v347_v8 = vpop.f32.mrf.mxu0 }
 0x42d   :  { %v1488_v9 = vpack.c.bf16 %v347_v8, %v299_v5 }
 0x42e   :  { %v1552_v10 = vpop.f32.mrf.mxu1  ;;  %v1557_v11 = vpop.f32.mrf.mxu0 }
 0x42f   :  { %1564 = vmatmul.mubr.msk.bf16.vlgmr.msra.gmra.mxu1 %vm133_vm2, %v1488_v9 }
 0x430   :  { %v350_v12 = vpop.f32.mrf.mxu0  ;;  %1576 = vmatpush3.bf16.msra.mxu1 %v1930_v55  ;;  %1579 = vmatprep.mubr.msk.bf16.mxu1 %vm1846_vm0, %v1845_v0 }
 0x431   :  { %1577 = vmatprep.subr.bf16.mxu1 %v1845_v0 }
 0x432   :  { %v1558_v13 = vpop.f32.mrf.mxu0 }
 0x434   :  { %v463_v15 = vpop.f32.mrf.mxu0  ;;  %1578 = vmatpush3.bf16.msra.mxu1 %v1936_v59 }
 0x435   :  { %v491_v16 = vadd.f32 %v1972_v14, %v463_v15  ;;  %1591 = vmatprep.subr.bf16.mxu1 %v1845_v0  ;;  %v470_v27 = vrot.slane %v463_v15, 1 }
 0x436   :  { %v1573_v17 = vpop.f32.mrf.mxu0 }
 0x437   :  { %494 = vrot.lane.b32.xlu0 %v491_v16, %s1848_s14  ;;  %v493_v18 = vrot.slane %v491_v16, 1 }
 0x438   :  { %v466_v19 = vpop.f32.mrf.mxu0 }
 0x439   :  { %496 = vrot.lane.b32.xlu1 %v493_v18, %s1848_s14 }
 0x43a   :  { %v1574_v20 = vpop.f32.mrf.mxu0 }
 0x4a9   :  { %v495_v41 = vpop.permute.xlu0 %494 }
 0x4ab   :  { %v497_v37 = vpop.permute.xlu1 %496 }
 0x4ef   :  { %v408_v22 = vpop.f32.mrf.mxu1 }
 0x4f0   :  { %v1982_v23 = vadd.f32 %v1458_v21, %v408_v22 }
 0x4f1   :  { %v1565_v24 = vpop.f32.mrf.mxu1 }
 0x4f2   :  { %v473_v25 = vadd.f32 %v463_v15, %v1982_v23 }
 0x4f3   :  { %v411_v26 = vpop.f32.mrf.mxu1 }
 0x4f4   :  { %v1985_v28 = vadd.f32 %v1458_v21, %v411_v26  ;;  %v1462_v29 = vmul.f32 -1.442695, %v473_v25 }
 0x4f5   :  { %v1566_v30 = vpop.f32.mrf.mxu1 }
 0x4f6   :  { %v474_v31 = vadd.f32 %v470_v27, %v1985_v28  ;;  %1658 = vpow2.f32 %v1462_v29 }
 0x4f8   :  { %v1463_v32 = vmul.f32 -1.442695, %v474_v31 }
 0x4fa   :  { %1660 = vpow2.f32 %v1463_v32 }
 0x503   :  { %v1659_v33 = vpop.eup %1658 }
 0x504   :  { %v481_v35 = vadd.f32 1.0, %v1659_v33 }
 0x507   :  { %v1661_v34 = vpop.eup %1660 }
 0x508   :  { %v482_v36 = vadd.f32 1.0, %v1661_v34 }
 0x50a   :  { %1662 = vrcp.f32 %v482_v36 }
 0x50b   :  { %1664 = vrcp.f32 %v481_v35 }
 0x517   :  { %v1663_v38 = vpop.eup %1662 }
 0x518   :  { %v501_v39 = vmul.f32 %v1663_v38, %v497_v37  ;;  %v1665_v40 = vpop.eup %1664  ;;  %v515_v49 = vsub.f32 1.0, %v1663_v38  ;;  %v527_v51 = vmul.f32 0.0, %v1663_v38 }
 0x519   :  { %v500_v42 = vmul.f32 %v1665_v40, %v495_v41  ;;  %v514_v54 = vsub.f32 1.0, %v1665_v40  ;;  %v526_v58 = vmul.f32 0.0, %v1665_v40 }
 0x51a   :  { %506 = vrot.lane.b32.xlu1 %v501_v39, %s1848_s14 }
 0x51e   :  { %504 = vrot.lane.b32.xlu1 %v500_v42, %s1848_s14 }
 0x58c   :  { %v507_v43 = vpop.permute.xlu1 %506 }
 0x58d   :  { %v511_v44 = vadd.f32 %v507_v43, %v1985_v28 }
 0x58f   :  { %1666 = vtanh.f32 %v511_v44 }
 0x590   :  { %v505_v45 = vpop.permute.xlu1 %504 }
 0x591   :  { %v510_v46 = vadd.f32 %v505_v45, %v1982_v23 }
 0x593   :  { %1668 = vtanh.f32 %v510_v46 }
 0x59c   :  { %v1667_v47 = vpop.eup %1666 }
 0x59d   :  { %520 = vrot.lane.b32.xlu1 %v1667_v47, %s1847_s13 }
 0x5a0   :  { %v1669_v48 = vpop.eup %1668 }
 0x5a1   :  { %518 = vrot.lane.b32.xlu1 %v1669_v48, %s1847_s13 }
 0x60f   :  { %v521_v50 = vpop.permute.xlu1 %520 }
 0x610   :  { %v525_v52 = vmul.f32 %v521_v50, %v515_v49 }
 0x612   :  { %v1994_v53 = vadd.f32 %v527_v51, %v525_v52 }
 0x613   :  { %v519_v56 = vpop.permute.xlu1 %518 }
 0x614   :  { %v531_v57 = vpack.c.bf16 %v1994_v53, %v1994_v53  ;;  %v524_v60 = vmul.f32 %v519_v56, %v514_v54  ;;  %v641_v36 = vrot.slane %v1994_v53, 7 }
 0x616   :  { %v535_v61 = vunpack.c.l.b16 %v531_v57  ;;  %v1998_v62 = vadd.f32 %v526_v58, %v524_v60 }
 0x618   :  { %v530_v63 = vpack.c.bf16 %v1998_v62, %v1998_v62  ;;  %v536_v1 = vrot.slane %v535_v61, 7  ;;  %v640_v39 = vrot.slane %v1998_v62, 7 }
 0x61a   :  { %v534_v2 = vunpack.c.l.b16 %v530_v63 }
 0x61c   :  { %v538_v3 = vsel %vm537_vm5, %v536_v1, %v534_v2 }
 0x61d   :  { %v539_v4 = vpack.c.b16 %v538_v3, %v538_v3 }
 0x61f   :  { %540 = vrot.lane.b32.xlu1 %v539_v4, %s1847_s13 }
 0x691   :  { %v541_v5 = vpop.permute.xlu1 %540 }
 0x692   :  { %1580 = vmatmul.mubr.msk.bf16.vlgmr.msra.gmra.mxu1 %vm133_vm2, %v541_v5 }
 0x693   :  { %1592 = vmatpush3.bf16.msra.mxu1 %v1930_v55  ;;  %1595 = vmatprep.mubr.msk.bf16.mxu1 %vm1846_vm0, %v1845_v0 }
 0x694   :  { %1593 = vmatprep.subr.bf16.mxu1 %v1845_v0 }
 0x697   :  { %1594 = vmatpush3.bf16.msra.mxu1 %v1936_v59 }
 0x698   :  { %1607 = vmatprep.subr.bf16.mxu1 %v1845_v0 }
 0x752   :  { %v579_v6 = vpop.f32.mrf.mxu1 }
 0x753   :  { %v603_v7 = vadd.f32 %v579_v6, %v1972_v14  ;;  %v586_v12 = vrot.slane %v579_v6, 7  ;;  %v590_v13 = vadd.f32 %v579_v6, %v1985_v28 }
 0x754   :  { %v1581_v8 = vpop.f32.mrf.mxu1 }
 0x755   :  { %608 = vrot.lane.b32.xlu1 %v603_v7, %s1848_s14  ;;  %v605_v9 = vrot.slane %v603_v7, 7  ;;  %v589_v15 = vadd.f32 %v586_v12, %v1982_v23  ;;  %v1466_v16 = vmul.f32 -1.442695, %v590_v13 }
 0x756   :  { %v582_v10 = vpop.f32.mrf.mxu1 }
 0x757   :  { %606 = vrot.lane.b32.xlu0 %v605_v9, %s1848_s14  ;;  %v1465_v17 = vmul.f32 -1.442695, %v589_v15  ;;  %1670 = vpow2.f32 %v1466_v16 }
 0x758   :  { %v1582_v11 = vpop.f32.mrf.mxu1 }
 0x759   :  { %1672 = vpow2.f32 %v1465_v17 }
 0x764   :  { %v1671_v18 = vpop.eup %1670 }
 0x765   :  { %v598_v20 = vadd.f32 1.0, %v1671_v18 }
 0x766   :  { %v1673_v19 = vpop.eup %1672 }
 0x767   :  { %v597_v21 = vadd.f32 1.0, %v1673_v19  ;;  %1674 = vrcp.f32 %v598_v20 }
 0x769   :  { %1676 = vrcp.f32 %v597_v21 }
 0x774   :  { %v1675_v22 = vpop.eup %1674 }
 0x775   :  { %v627_v37 = vsub.f32 1.0, %v1675_v22  ;;  %v645_v40 = vmul.f32 %v1675_v22, %v641_v36 }
 0x776   :  { %v1677_v26 = vpop.eup %1676 }
 0x777   :  { %v626_v42 = vsub.f32 1.0, %v1677_v26  ;;  %v644_v45 = vmul.f32 %v1677_v26, %v640_v39 }
 0x7c7   :  { %v609_v24 = vpop.permute.xlu1 %608 }
 0x7c8   :  { %v613_v25 = vmul.f32 %v1675_v22, %v609_v24 }
 0x7c9   :  { %v607_v27 = vpop.permute.xlu0 %606 }
 0x7ca   :  { %v612_v29 = vmul.f32 %v1677_v26, %v607_v27  ;;  %618 = vrot.lane.b32.xlu1 %v613_v25, %s1848_s14 }
 0x7cc   :  { %616 = vrot.lane.b32.xlu0 %v612_v29, %s1848_s14 }
 0x83c   :  { %v619_v30 = vpop.permute.xlu1 %618 }
 0x83d   :  { %v623_v31 = vadd.f32 %v619_v30, %v1985_v28 }
 0x83e   :  { %v617_v32 = vpop.permute.xlu0 %616 }
 0x83f   :  { %1678 = vtanh.f32 %v623_v31  ;;  %v622_v33 = vadd.f32 %v617_v32, %v1982_v23 }
 0x841   :  { %1680 = vtanh.f32 %v622_v33 }
 0x84c   :  { %v1679_v34 = vpop.eup %1678 }
 0x84d   :  { %632 = vrot.lane.b32.xlu1 %v1679_v34, %s1847_s13 }
 0x84e   :  { %v1681_v35 = vpop.eup %1680 }
 0x84f   :  { %630 = vrot.lane.b32.xlu0 %v1681_v35, %s1847_s13 }
 0x8bf   :  { %v633_v38 = vpop.permute.xlu1 %632 }
 0x8c0   :  { %v637_v41 = vmul.f32 %v633_v38, %v627_v37 }
 0x8c1   :  { %v631_v43 = vpop.permute.xlu0 %630 }
 0x8c2   :  { %v2024_v44 = vadd.f32 %v645_v40, %v637_v41  ;;  %v636_v46 = vmul.f32 %v631_v43, %v626_v42 }
 0x8c4   :  { %v2026_v47 = vadd.f32 %v644_v45, %v636_v46  ;;  %v649_v48 = vpack.c.bf16 %v2024_v44, %v2024_v44  ;;  %v760_v26 = vrot.slane %v2024_v44, 7 }
 0x8c6   :  { %v648_v49 = vpack.c.bf16 %v2026_v47, %v2026_v47  ;;  %v653_v51 = vunpack.c.l.b16 %v649_v48  ;;  %v759_v29 = vrot.slane %v2026_v47, 7 }
 0x8c8   :  { %v652_v50 = vunpack.c.l.b16 %v648_v49 }
 0x8ca   :  { %v654_v52 = vrot.slane %v652_v50, 1 }
 0x8cc   :  { %v655_v53 = vsel %vm537_vm5, %v653_v51, %v654_v52 }
 0x8cd   :  { %v656_v54 = vpack.c.b16 %v655_v53, %v655_v53 }
 0x8cf   :  { %657 = vrot.lane.b32.xlu0 %v656_v54, %s1847_s13 }
 0x941   :  { %v658_v56 = vpop.permute.xlu0 %657 }
 0x942   :  { %1588 = vmatmul.mubr.msk.bf16.vlgmr.msra.gmra.mxu0 %vm133_vm2, %v658_v56 }
 0x943   :  { %1600 = vmatpush3.bf16.msra.mxu0 %v1930_v55  ;;  %1603 = vmatprep.mubr.msk.bf16.mxu0 %vm1846_vm0, %v1845_v0 }
 0x944   :  { %1601 = vmatprep.subr.bf16.mxu0 %v1845_v0 }
 0x947   :  { %1602 = vmatpush3.bf16.msra.mxu0 %v1936_v59 }
 0x948   :  { %1615 = vmatprep.subr.bf16.mxu0 %v1845_v0 }
 0xa02   :  { %v696_v57 = vpop.f32.mrf.mxu0 }
 0xa03   :  { %v721_v58 = vadd.f32 %v696_v57, %v1972_v14  ;;  %v703_v2 = vrot.slane %v696_v57, 6  ;;  %v704_v3 = vrot.slane %v696_v57, 7 }
 0xa04   :  { %v1589_v60 = vpop.f32.mrf.mxu0 }
 0xa05   :  { %v724_v61 = vrot.slane %v721_v58, 7  ;;  %v723_v62 = vrot.slane %v721_v58, 6  ;;  %v707_v4 = vadd.f32 %v703_v2, %v1982_v23  ;;  %v708_v5 = vadd.f32 %v704_v3, %v1985_v28 }
 0xa06   :  { %v699_v63 = vpop.f32.mrf.mxu0 }
 0xa07   :  { %727 = vrot.lane.b32.xlu0 %v724_v61, %s1848_s14  ;;  %725 = vrot.lane.b32.xlu1 %v723_v62, %s1848_s14  ;;  %v1468_v6 = vmul.f32 -1.442695, %v707_v4  ;;  %v1469_v7 = vmul.f32 -1.442695, %v708_v5 }
 0xa08   :  { %v1590_v1 = vpop.f32.mrf.mxu0 }
 0xa09   :  { %1682 = vpow2.f32 %v1468_v6 }
 0xa0a   :  { %1684 = vpow2.f32 %v1469_v7 }
 0xa16   :  { %v1683_v8 = vpop.eup %1682 }
 0xa17   :  { %v1685_v9 = vpop.eup %1684  ;;  %v715_v10 = vadd.f32 1.0, %v1683_v8 }
 0xa18   :  { %v716_v11 = vadd.f32 1.0, %v1685_v9 }
 0xa19   :  { %1686 = vrcp.f32 %v715_v10 }
 0xa1a   :  { %1688 = vrcp.f32 %v716_v11 }
 0xa26   :  { %v1687_v12 = vpop.eup %1686 }
 0xa27   :  { %v1689_v13 = vpop.eup %1688  ;;  %v745_v31 = vsub.f32 1.0, %v1687_v12  ;;  %v763_v35 = vmul.f32 %v1687_v12, %v759_v29 }
 0xa28   :  { %v746_v27 = vsub.f32 1.0, %v1689_v13  ;;  %v764_v32 = vmul.f32 %v1689_v13, %v760_v26 }
 0xa79   :  { %v728_v15 = vpop.permute.xlu0 %727  ;;  %v726_v16 = vpop.permute.xlu1 %725 }
 0xa7a   :  { %v732_v17 = vmul.f32 %v1689_v13, %v728_v15  ;;  %v731_v18 = vmul.f32 %v1687_v12, %v726_v16 }
 0xa7c   :  { %737 = vrot.lane.b32.xlu0 %v732_v17, %s1848_s14  ;;  %735 = vrot.lane.b32.xlu1 %v731_v18, %s1848_s14 }
 0xaee   :  { %v738_v19 = vpop.permute.xlu0 %737  ;;  %v736_v20 = vpop.permute.xlu1 %735 }
 0xaef   :  { %v742_v21 = vadd.f32 %v738_v19, %v1985_v28  ;;  %v741_v22 = vadd.f32 %v736_v20, %v1982_v23 }
 0xaf1   :  { %1690 = vtanh.f32 %v742_v21 }
 0xaf2   :  { %1692 = vtanh.f32 %v741_v22 }
 0xafe   :  { %v1691_v24 = vpop.eup %1690 }
 0xaff   :  { %v1693_v25 = vpop.eup %1692  ;;  %751 = vrot.lane.b32.xlu0 %v1691_v24, %s1847_s13 }
 0xb00   :  { %749 = vrot.lane.b32.xlu1 %v1693_v25, %s1847_s13 }
 0xb71   :  { %v752_v30 = vpop.permute.xlu0 %751 }
 0xb72   :  { %v756_v33 = vmul.f32 %v752_v30, %v746_v27  ;;  %v750_v34 = vpop.permute.xlu1 %749 }
 0xb73   :  { %v755_v36 = vmul.f32 %v750_v34, %v745_v31 }
 0xb74   :  { %v2054_v37 = vadd.f32 %v764_v32, %v756_v33 }
 0xb75   :  { %v2056_v38 = vadd.f32 %v763_v35, %v755_v36 }
 0xb76   :  { %v768_v39 = vpack.c.bf16 %v2054_v37, %v2054_v37  ;;  %v880_v17 = vrot.slane %v2054_v37, 7 }
 0xb77   :  { %v767_v40 = vpack.c.bf16 %v2056_v38, %v2056_v38  ;;  %v879_v19 = vrot.slane %v2056_v38, 7 }
 0xb78   :  { %v772_v41 = vunpack.c.l.b16 %v768_v39 }
 0xb79   :  { %v771_v42 = vunpack.c.l.b16 %v767_v40 }
 0xb7a   :  { %v774_v43 = vrot.slane %v772_v41, 1 }
 0xb7b   :  { %v773_v44 = vrot.slane %v771_v42, 2 }
 0xb7d   :  { %v775_v45 = vsel %vm537_vm5, %v774_v43, %v773_v44 }
 0xb7e   :  { %v776_v46 = vpack.c.b16 %v775_v45, %v775_v45 }
 0xb80   :  { %777 = vrot.lane.b32.xlu1 %v776_v46, %s1847_s13 }
 0xbf2   :  { %v778_v47 = vpop.permute.xlu1 %777 }
 0xbf3   :  { %1596 = vmatmul.mubr.msk.bf16.vlgmr.msra.gmra.mxu1 %vm133_vm2, %v778_v47 }
 0xbf4   :  { %1608 = vmatpush3.bf16.msra.mxu1 %v1930_v55  ;;  %1611 = vmatprep.mubr.msk.bf16.mxu1 %vm1846_vm0, %v1845_v0 }
 0xbf5   :  { %1609 = vmatprep.subr.bf16.mxu1 %v1845_v0 }
 0xbf8   :  { %1610 = vmatpush3.bf16.msra.mxu1 %v1936_v59 }
 0xbf9   :  { %1623 = vmatprep.subr.bf16.mxu1 %v1845_v0 }
 0xcb3   :  { %v816_v48 = vpop.f32.mrf.mxu1 }
 0xcb4   :  { %v841_v49 = vadd.f32 %v816_v48, %v1972_v14  ;;  %v823_v56 = vrot.slane %v816_v48, 5  ;;  %v824_v57 = vrot.slane %v816_v48, 6 }
 0xcb5   :  { %v1597_v50 = vpop.f32.mrf.mxu1 }
 0xcb6   :  { %v844_v51 = vrot.slane %v841_v49, 6  ;;  %v843_v52 = vrot.slane %v841_v49, 5  ;;  %v827_v58 = vadd.f32 %v823_v56, %v1982_v23  ;;  %v828_v60 = vadd.f32 %v824_v57, %v1985_v28 }
 0xcb7   :  { %v819_v53 = vpop.f32.mrf.mxu1 }
 0xcb8   :  { %847 = vrot.lane.b32.xlu1 %v844_v51, %s1848_s14  ;;  %845 = vrot.lane.b32.xlu0 %v843_v52, %s1848_s14  ;;  %v1471_v61 = vmul.f32 -1.442695, %v827_v58  ;;  %v1472_v62 = vmul.f32 -1.442695, %v828_v60 }
 0xcb9   :  { %v1598_v54 = vpop.f32.mrf.mxu1 }
 0xcba   :  { %1694 = vpow2.f32 %v1471_v61 }
 0xcbb   :  { %1696 = vpow2.f32 %v1472_v62 }
 0xcc7   :  { %v1695_v63 = vpop.eup %1694 }
 0xcc8   :  { %v1697_v1 = vpop.eup %1696  ;;  %v835_v2 = vadd.f32 1.0, %v1695_v63 }
 0xcc9   :  { %v836_v3 = vadd.f32 1.0, %v1697_v1 }
 0xcca   :  { %1698 = vrcp.f32 %v835_v2 }
 0xccb   :  { %1700 = vrcp.f32 %v836_v3 }
 0xcd7   :  { %v1699_v4 = vpop.eup %1698 }
 0xcd8   :  { %v1701_v5 = vpop.eup %1700  ;;  %v865_v21 = vsub.f32 1.0, %v1699_v4  ;;  %v883_v26 = vmul.f32 %v1699_v4, %v879_v19 }
 0xcd9   :  { %v866_v18 = vsub.f32 1.0, %v1701_v5  ;;  %v884_v22 = vmul.f32 %v1701_v5, %v880_v17 }
 0xd2a   :  { %v848_v6 = vpop.permute.xlu1 %847  ;;  %v846_v7 = vpop.permute.xlu0 %845 }
 0xd2b   :  { %v852_v8 = vmul.f32 %v1701_v5, %v848_v6  ;;  %v851_v9 = vmul.f32 %v1699_v4, %v846_v7 }
 0xd2d   :  { %857 = vrot.lane.b32.xlu1 %v852_v8, %s1848_s14  ;;  %855 = vrot.lane.b32.xlu0 %v851_v9, %s1848_s14 }
 0xd9f   :  { %v858_v10 = vpop.permute.xlu1 %857  ;;  %v856_v11 = vpop.permute.xlu0 %855 }
 0xda0   :  { %v862_v12 = vadd.f32 %v858_v10, %v1985_v28  ;;  %v861_v13 = vadd.f32 %v856_v11, %v1982_v23 }
 0xda2   :  { %1702 = vtanh.f32 %v862_v12 }
 0xda3   :  { %1704 = vtanh.f32 %v861_v13 }
 0xdaf   :  { %v1703_v15 = vpop.eup %1702 }
 0xdb0   :  { %v1705_v16 = vpop.eup %1704  ;;  %871 = vrot.lane.b32.xlu1 %v1703_v15, %s1847_s13 }
 0xdb1   :  { %869 = vrot.lane.b32.xlu0 %v1705_v16, %s1847_s13 }
 0xe22   :  { %v872_v20 = vpop.permute.xlu1 %871 }
 0xe23   :  { %v876_v24 = vmul.f32 %v872_v20, %v866_v18  ;;  %v870_v25 = vpop.permute.xlu0 %869 }
 0xe24   :  { %v875_v27 = vmul.f32 %v870_v25, %v865_v21 }
 0xe25   :  { %v2084_v29 = vadd.f32 %v884_v22, %v876_v24 }
 0xe26   :  { %v2086_v30 = vadd.f32 %v883_v26, %v875_v27 }
 0xe27   :  { %v888_v31 = vpack.c.bf16 %v2084_v29, %v2084_v29  ;;  %v1000_v8 = vrot.slane %v2084_v29, 7 }
 0xe28   :  { %v887_v32 = vpack.c.bf16 %v2086_v30, %v2086_v30  ;;  %v999_v10 = vrot.slane %v2086_v30, 7 }
 0xe29   :  { %v892_v33 = vunpack.c.l.b16 %v888_v31 }
 0xe2a   :  { %v891_v34 = vunpack.c.l.b16 %v887_v32 }
 0xe2b   :  { %v894_v35 = vrot.slane %v892_v33, 2 }
 0xe2c   :  { %v893_v36 = vrot.slane %v891_v34, 3 }
 0xe2e   :  { %v895_v37 = vsel %vm537_vm5, %v894_v35, %v893_v36 }
 0xe2f   :  { %v896_v38 = vpack.c.b16 %v895_v37, %v895_v37 }
 0xe31   :  { %897 = vrot.lane.b32.xlu0 %v896_v38, %s1847_s13 }
 0xea3   :  { %v898_v39 = vpop.permute.xlu0 %897 }
 0xea4   :  { %1604 = vmatmul.mubr.msk.bf16.vlgmr.msra.gmra.mxu0 %vm133_vm2, %v898_v39 }
 0xea5   :  { %1616 = vmatpush3.bf16.msra.mxu0 %v1930_v55  ;;  %1619 = vmatprep.mubr.msk.bf16.mxu0 %vm1846_vm0, %v1845_v0 }
 0xea6   :  { %1617 = vmatprep.subr.bf16.mxu0 %v1845_v0 }
 0xea9   :  { %1618 = vmatpush3.bf16.msra.mxu0 %v1936_v59 }
 0xeaa   :  { %1631 = vmatprep.subr.bf16.mxu0 %v1845_v0 }
 0xf64   :  { %v936_v40 = vpop.f32.mrf.mxu0 }
 0xf65   :  { %v961_v41 = vadd.f32 %v936_v40, %v1972_v14  ;;  %v943_v47 = vrot.slane %v936_v40, 4  ;;  %v944_v48 = vrot.slane %v936_v40, 5 }
 0xf66   :  { %v1605_v42 = vpop.f32.mrf.mxu0 }
 0xf67   :  { %v964_v43 = vrot.slane %v961_v41, 5  ;;  %v963_v44 = vrot.slane %v961_v41, 4  ;;  %v947_v49 = vadd.f32 %v943_v47, %v1982_v23  ;;  %v948_v50 = vadd.f32 %v944_v48, %v1985_v28 }
 0xf68   :  { %v939_v45 = vpop.f32.mrf.mxu0 }
 0xf69   :  { %967 = vrot.lane.b32.xlu0 %v964_v43, %s1848_s14  ;;  %965 = vrot.lane.b32.xlu1 %v963_v44, %s1848_s14  ;;  %v1474_v51 = vmul.f32 -1.442695, %v947_v49  ;;  %v1475_v52 = vmul.f32 -1.442695, %v948_v50 }
 0xf6a   :  { %v1606_v46 = vpop.f32.mrf.mxu0 }
 0xf6b   :  { %1706 = vpow2.f32 %v1474_v51 }
 0xf6c   :  { %1708 = vpow2.f32 %v1475_v52 }
 0xf78   :  { %v1707_v53 = vpop.eup %1706 }
 0xf79   :  { %v1709_v54 = vpop.eup %1708  ;;  %v955_v56 = vadd.f32 1.0, %v1707_v53 }
 0xf7a   :  { %v956_v57 = vadd.f32 1.0, %v1709_v54 }
 0xf7b   :  { %1710 = vrcp.f32 %v955_v56 }
 0xf7c   :  { %1712 = vrcp.f32 %v956_v57 }
 0xf88   :  { %v1711_v58 = vpop.eup %1710 }
 0xf89   :  { %v1713_v60 = vpop.eup %1712  ;;  %v985_v12 = vsub.f32 1.0, %v1711_v58  ;;  %v1003_v17 = vmul.f32 %v1711_v58, %v999_v10 }
 0xf8a   :  { %v986_v9 = vsub.f32 1.0, %v1713_v60  ;;  %v1004_v13 = vmul.f32 %v1713_v60, %v1000_v8 }
 0xfdb   :  { %v968_v61 = vpop.permute.xlu0 %967  ;;  %v966_v62 = vpop.permute.xlu1 %965 }
 0xfdc   :  { %v972_v63 = vmul.f32 %v1713_v60, %v968_v61  ;;  %v971_v1 = vmul.f32 %v1711_v58, %v966_v62 }
 0xfde   :  { %977 = vrot.lane.b32.xlu0 %v972_v63, %s1848_s14  ;;  %975 = vrot.lane.b32.xlu1 %v971_v1, %s1848_s14 }
0x1050   :  { %v978_v2 = vpop.permute.xlu0 %977  ;;  %v976_v3 = vpop.permute.xlu1 %975 }
0x1051   :  { %v982_v4 = vadd.f32 %v978_v2, %v1985_v28  ;;  %v981_v5 = vadd.f32 %v976_v3, %v1982_v23 }
0x1053   :  { %1714 = vtanh.f32 %v982_v4 }
0x1054   :  { %1716 = vtanh.f32 %v981_v5 }
0x1060   :  { %v1715_v6 = vpop.eup %1714 }
0x1061   :  { %v1717_v7 = vpop.eup %1716  ;;  %991 = vrot.lane.b32.xlu0 %v1715_v6, %s1847_s13 }
0x1062   :  { %989 = vrot.lane.b32.xlu1 %v1717_v7, %s1847_s13 }
0x10d3   :  { %v992_v11 = vpop.permute.xlu0 %991 }
0x10d4   :  { %v996_v15 = vmul.f32 %v992_v11, %v986_v9  ;;  %v990_v16 = vpop.permute.xlu1 %989 }
0x10d5   :  { %v995_v18 = vmul.f32 %v990_v16, %v985_v12 }
0x10d6   :  { %v2114_v19 = vadd.f32 %v1004_v13, %v996_v15 }
0x10d7   :  { %v2116_v20 = vadd.f32 %v1003_v17, %v995_v18 }
0x10d8   :  { %v1008_v21 = vpack.c.bf16 %v2114_v19, %v2114_v19  ;;  %v1120_v61 = vrot.slane %v2114_v19, 7 }
0x10d9   :  { %v1007_v22 = vpack.c.bf16 %v2116_v20, %v2116_v20  ;;  %v1119_v63 = vrot.slane %v2116_v20, 7 }
0x10da   :  { %v1012_v24 = vunpack.c.l.b16 %v1008_v21 }
0x10db   :  { %v1011_v25 = vunpack.c.l.b16 %v1007_v22 }
0x10dc   :  { %v1014_v26 = vrot.slane %v1012_v24, 3 }
0x10dd   :  { %v1013_v27 = vrot.slane %v1011_v25, 4 }
0x10df   :  { %v1015_v29 = vsel %vm537_vm5, %v1014_v26, %v1013_v27 }
0x10e0   :  { %v1016_v30 = vpack.c.b16 %v1015_v29, %v1015_v29 }
0x10e2   :  { %1017 = vrot.lane.b32.xlu1 %v1016_v30, %s1847_s13 }
0x1154   :  { %v1018_v31 = vpop.permute.xlu1 %1017 }
0x1155   :  { %1612 = vmatmul.mubr.msk.bf16.vlgmr.msra.gmra.mxu1 %vm133_vm2, %v1018_v31 }
0x1156   :  { %1624 = vmatpush3.bf16.msra.mxu1 %v1930_v55  ;;  %1627 = vmatprep.mubr.msk.bf16.mxu1 %vm1846_vm0, %v1845_v0 }
0x1157   :  { %1625 = vmatprep.subr.bf16.mxu1 %v1845_v0 }
0x115a   :  { %1626 = vmatpush3.bf16.msra.mxu1 %v1936_v59 }
0x1215   :  { %v1056_v32 = vpop.f32.mrf.mxu1 }
0x1216   :  { %v1081_v33 = vadd.f32 %v1056_v32, %v1972_v14  ;;  %v1063_v55 = vrot.slane %v1056_v32, 3  ;;  %v1064_v39 = vrot.slane %v1056_v32, 4 }
0x1217   :  { %v1613_v34 = vpop.f32.mrf.mxu1 }
0x1218   :  { %v1084_v35 = vrot.slane %v1081_v33, 4  ;;  %v1083_v36 = vrot.slane %v1081_v33, 3  ;;  %v1067_v40 = vadd.f32 %v1063_v55, %v1982_v23  ;;  %v1068_v41 = vadd.f32 %v1064_v39, %v1985_v28 }
0x1219   :  { %v1059_v37 = vpop.f32.mrf.mxu1 }
0x121a   :  { %1087 = vrot.lane.b32.xlu1 %v1084_v35, %s1848_s14  ;;  %1085 = vrot.lane.b32.xlu0 %v1083_v36, %s1848_s14  ;;  %v1477_v42 = vmul.f32 -1.442695, %v1067_v40  ;;  %v1478_v59 = vmul.f32 -1.442695, %v1068_v41 }
0x121b   :  { %v1614_v38 = vpop.f32.mrf.mxu1 }
0x121c   :  { %1718 = vpow2.f32 %v1477_v42 }
0x121d   :  { %1720 = vpow2.f32 %v1478_v59 }
0x1229   :  { %v1719_v43 = vpop.eup %1718 }
0x122a   :  { %v1721_v44 = vpop.eup %1720  ;;  %v1075_v45 = vadd.f32 1.0, %v1719_v43 }
0x122b   :  { %v1076_v46 = vadd.f32 1.0, %v1721_v44 }
0x122c   :  { %1722 = vrcp.f32 %v1075_v45 }
0x122d   :  { %1724 = vrcp.f32 %v1076_v46 }
0x1239   :  { %v1723_v47 = vpop.eup %1722 }
0x123a   :  { %v1725_v48 = vpop.eup %1724  ;;  %v1105_v2 = vsub.f32 1.0, %v1723_v47  ;;  %v1123_v6 = vmul.f32 %v1723_v47, %v1119_v63 }
0x123b   :  { %v1106_v62 = vsub.f32 1.0, %v1725_v48  ;;  %v1124_v3 = vmul.f32 %v1725_v48, %v1120_v61 }
0x128c   :  { %v1088_v49 = vpop.permute.xlu1 %1087  ;;  %v1086_v50 = vpop.permute.xlu0 %1085 }
0x128d   :  { %v1092_v51 = vmul.f32 %v1725_v48, %v1088_v49  ;;  %v1091_v52 = vmul.f32 %v1723_v47, %v1086_v50 }
0x128f   :  { %1097 = vrot.lane.b32.xlu1 %v1092_v51, %s1848_s14  ;;  %1095 = vrot.lane.b32.xlu0 %v1091_v52, %s1848_s14 }
0x1301   :  { %v1098_v53 = vpop.permute.xlu1 %1097  ;;  %v1096_v54 = vpop.permute.xlu0 %1095 }
0x1302   :  { %v1102_v56 = vadd.f32 %v1098_v53, %v1985_v28  ;;  %v1101_v57 = vadd.f32 %v1096_v54, %v1982_v23 }
0x1304   :  { %1726 = vtanh.f32 %v1102_v56 }
0x1305   :  { %1728 = vtanh.f32 %v1101_v57 }
0x1311   :  { %v1727_v58 = vpop.eup %1726 }
0x1312   :  { %v1729_v60 = vpop.eup %1728  ;;  %1111 = vrot.lane.b32.xlu1 %v1727_v58, %s1847_s13 }
0x1313   :  { %1109 = vrot.lane.b32.xlu0 %v1729_v60, %s1847_s13 }
0x1384   :  { %v1112_v1 = vpop.permute.xlu1 %1111 }
0x1385   :  { %v1116_v4 = vmul.f32 %v1112_v1, %v1106_v62  ;;  %v1110_v5 = vpop.permute.xlu0 %1109 }
0x1386   :  { %v1115_v7 = vmul.f32 %v1110_v5, %v1105_v2 }
0x1387   :  { %v1126_v8 = vadd.f32 %v1124_v3, %v1116_v4 }
0x1388   :  { %v2143_v9 = vadd.f32 %v1123_v6, %v1115_v7 }
0x1389   :  { %v1128_v10 = vpack.c.bf16 %v1126_v8, %v1126_v8  ;;  %v1240_v49 = vrot.slane %v1126_v8, 7 }
0x138a   :  { %v1127_v11 = vpack.c.bf16 %v2143_v9, %v2143_v9  ;;  %v1239_v51 = vrot.slane %v2143_v9, 7 }
0x138b   :  { %v1132_v12 = vunpack.c.l.b16 %v1128_v10 }
0x138c   :  { %v1131_v13 = vunpack.c.l.b16 %v1127_v11 }
0x138d   :  { %v1134_v15 = vrot.slane %v1132_v12, 4 }
0x138e   :  { %v1133_v16 = vrot.slane %v1131_v13, 5 }
0x1390   :  { %v1135_v17 = vsel %vm537_vm5, %v1134_v15, %v1133_v16 }
0x1391   :  { %v1136_v18 = vpack.c.b16 %v1135_v17, %v1135_v17 }
0x1393   :  { %1137 = vrot.lane.b32.xlu0 %v1136_v18, %s1847_s13 }
0x1405   :  { %v1138_v19 = vpop.permute.xlu0 %1137 }
0x1406   :  { %1620 = vmatmul.mubr.msk.bf16.vlgmr.msra.gmra.mxu0 %vm133_vm2, %v1138_v19 }
0x1407   :  { %1635 = vmatprep.mubr.msk.bf16.mxu0 %vm1846_vm0, %v1845_v0 }
0x14c6   :  { %v1176_v20 = vpop.f32.mrf.mxu0 }
0x14c7   :  { %v1201_v21 = vadd.f32 %v1176_v20, %v1972_v14  ;;  %v1183_v29 = vrot.slane %v1176_v20, 2  ;;  %v1184_v30 = vrot.slane %v1176_v20, 3 }
0x14c8   :  { %v1621_v22 = vpop.f32.mrf.mxu0 }
0x14c9   :  { %v1204_v24 = vrot.slane %v1201_v21, 3  ;;  %v1203_v25 = vrot.slane %v1201_v21, 2  ;;  %v1187_v31 = vadd.f32 %v1183_v29, %v1982_v23  ;;  %v1188_v32 = vadd.f32 %v1184_v30, %v1985_v28 }
0x14ca   :  { %v1179_v26 = vpop.f32.mrf.mxu0 }
0x14cb   :  { %1207 = vrot.lane.b32.xlu0 %v1204_v24, %s1848_s14  ;;  %1205 = vrot.lane.b32.xlu1 %v1203_v25, %s1848_s14  ;;  %v1480_v33 = vmul.f32 -1.442695, %v1187_v31  ;;  %v1481_v34 = vmul.f32 -1.442695, %v1188_v32 }
0x14cc   :  { %v1622_v27 = vpop.f32.mrf.mxu0 }
0x14cd   :  { %1730 = vpow2.f32 %v1480_v33 }
0x14ce   :  { %1732 = vpow2.f32 %v1481_v34 }
0x14da   :  { %v1731_v35 = vpop.eup %1730 }
0x14db   :  { %v1733_v36 = vpop.eup %1732  ;;  %v1195_v37 = vadd.f32 1.0, %v1731_v35 }
0x14dc   :  { %v1196_v38 = vadd.f32 1.0, %v1733_v36 }
0x14dd   :  { %1734 = vrcp.f32 %v1195_v37 }
0x14de   :  { %1736 = vrcp.f32 %v1196_v38 }
0x14ea   :  { %v1735_v55 = vpop.eup %1734 }
0x14eb   :  { %v1737_v39 = vpop.eup %1736  ;;  %v1225_v53 = vsub.f32 1.0, %v1735_v55  ;;  %v1243_v58 = vmul.f32 %v1735_v55, %v1239_v51 }
0x14ec   :  { %v1226_v50 = vsub.f32 1.0, %v1737_v39  ;;  %v1244_v54 = vmul.f32 %v1737_v39, %v1240_v49 }
0x153d   :  { %v1208_v40 = vpop.permute.xlu0 %1207  ;;  %v1206_v41 = vpop.permute.xlu1 %1205 }
0x153e   :  { %v1212_v42 = vmul.f32 %v1737_v39, %v1208_v40  ;;  %v1211_v59 = vmul.f32 %v1735_v55, %v1206_v41  ;;  %v1371_v39 = vld [vmem:[%s2214_s4 + $0x10] sm:$0xff]  ;;  %v1372_v40 = vld [vmem:[%s2214_s4 + $0x18] sm:$0xff]  ;;  %v1370_v41 = vld [vmem:[%s2214_s4 + $0x8] sm:$0xff] }
0x1540   :  { %1217 = vrot.lane.b32.xlu0 %v1212_v42, %s1848_s14  ;;  %1215 = vrot.lane.b32.xlu1 %v1211_v59, %s1848_s14 }
0x15b2   :  { %v1218_v43 = vpop.permute.xlu0 %1217  ;;  %v1216_v44 = vpop.permute.xlu1 %1215 }
0x15b3   :  { %v1222_v45 = vadd.f32 %v1218_v43, %v1985_v28  ;;  %v1221_v46 = vadd.f32 %v1216_v44, %v1982_v23 }
0x15b5   :  { %1738 = vtanh.f32 %v1222_v45 }
0x15b6   :  { %1740 = vtanh.f32 %v1221_v46 }
0x15c2   :  { %v1739_v47 = vpop.eup %1738 }
0x15c3   :  { %v1741_v48 = vpop.eup %1740  ;;  %1231 = vrot.lane.b32.xlu0 %v1739_v47, %s1847_s13 }
0x15c4   :  { %1229 = vrot.lane.b32.xlu1 %v1741_v48, %s1847_s13 }
0x1635   :  { %v1232_v52 = vpop.permute.xlu0 %1231 }
0x1636   :  { %v1236_v56 = vmul.f32 %v1232_v52, %v1226_v50  ;;  %v1230_v57 = vpop.permute.xlu1 %1229 }
0x1637   :  { %v1235_v60 = vmul.f32 %v1230_v57, %v1225_v53 }
0x1638   :  { %v2164_v61 = vadd.f32 %v1244_v54, %v1236_v56 }
0x1639   :  { %v2166_v62 = vadd.f32 %v1243_v58, %v1235_v60 }
0x163a   :  { %v1248_v63 = vpack.c.bf16 %v2164_v61, %v2164_v61  ;;  %v1360_v59 = vrot.slane %v2164_v61, 7 }
0x163b   :  { %v1247_v1 = vpack.c.bf16 %v2166_v62, %v2166_v62  ;;  %v1359_v44 = vrot.slane %v2166_v62, 7 }
0x163c   :  { %v1252_v2 = vunpack.c.l.b16 %v1248_v63 }
0x163d   :  { %v1251_v3 = vunpack.c.l.b16 %v1247_v1  ;;  %v1485_v1 = vld [vmem:[%s2215_s5 + $0x3] ss:$0 sm:$0xff] }
0x163e   :  { %v1254_v4 = vrot.slane %v1252_v2, 5 }
0x163f   :  { %v1253_v5 = vrot.slane %v1251_v3, 6 }
0x1641   :  { %v1255_v6 = vsel %vm537_vm5, %v1254_v4, %v1253_v5 }
0x1642   :  { %v1256_v7 = vpack.c.b16 %v1255_v6, %v1255_v6 }
0x1644   :  { %1257 = vrot.lane.b32.xlu1 %v1256_v7, %s1847_s13 }
0x16b6   :  { %v1258_v8 = vpop.permute.xlu1 %1257 }
0x16b7   :  { %1628 = vmatmul.mubr.msk.bf16.vlgmr.msra.gmra.mxu1 %vm133_vm2, %v1258_v8 }
0x1777   :  { %v1296_v9 = vpop.f32.mrf.mxu1 }
0x1778   :  { %v1321_v10 = vadd.f32 %v1296_v9, %v1972_v14  ;;  %v1303_v17 = vrot.slane %v1296_v9, 1  ;;  %v1304_v18 = vrot.slane %v1296_v9, 2 }
0x1779   :  { %v1629_v11 = vpop.f32.mrf.mxu1 }
0x177a   :  { %v1324_v12 = vrot.slane %v1321_v10, 2  ;;  %v1323_v13 = vrot.slane %v1321_v10, 1  ;;  %v1307_v19 = vadd.f32 %v1303_v17, %v1982_v23  ;;  %v1308_v20 = vadd.f32 %v1304_v18, %v1985_v28 }
0x177b   :  { %v1299_v15 = vpop.f32.mrf.mxu1 }
0x177c   :  { %1327 = vrot.lane.b32.xlu1 %v1324_v12, %s1848_s14  ;;  %1325 = vrot.lane.b32.xlu0 %v1323_v13, %s1848_s14  ;;  %v1483_v21 = vmul.f32 -1.442695, %v1307_v19  ;;  %v1484_v22 = vmul.f32 -1.442695, %v1308_v20 }
0x177d   :  { %v1630_v16 = vpop.f32.mrf.mxu1 }
0x177e   :  { %1742 = vpow2.f32 %v1483_v21 }
0x177f   :  { %1744 = vpow2.f32 %v1484_v22 }
0x178b   :  { %v1743_v14 = vpop.eup %1742 }
0x178c   :  { %v1745_v24 = vpop.eup %1744  ;;  %v1315_v25 = vadd.f32 1.0, %v1743_v14 }
0x178d   :  { %v1316_v26 = vadd.f32 1.0, %v1745_v24 }
0x178e   :  { %1746 = vrcp.f32 %v1315_v25 }
0x178f   :  { %1748 = vrcp.f32 %v1316_v26 }
0x179b   :  { %v1747_v27 = vpop.eup %1746 }
0x179c   :  { %v1749_v29 = vpop.eup %1748  ;;  %v1345_v46 = vsub.f32 1.0, %v1747_v27  ;;  %v1363_v50 = vmul.f32 %v1747_v27, %v1359_v44 }
0x179d   :  { %v1346_v43 = vsub.f32 1.0, %v1749_v29  ;;  %v1364_v47 = vmul.f32 %v1749_v29, %v1360_v59 }
0x17ee   :  { %v1328_v30 = vpop.permute.xlu1 %1327  ;;  %v1326_v31 = vpop.permute.xlu0 %1325 }
0x17ef   :  { %v1332_v32 = vmul.f32 %v1749_v29, %v1328_v30  ;;  %v1331_v33 = vmul.f32 %v1747_v27, %v1326_v31 }
0x17f1   :  { %1337 = vrot.lane.b32.xlu1 %v1332_v32, %s1848_s14  ;;  %1335 = vrot.lane.b32.xlu0 %v1331_v33, %s1848_s14 }
0x1863   :  { %v1338_v34 = vpop.permute.xlu1 %1337  ;;  %v1336_v35 = vpop.permute.xlu0 %1335 }
0x1864   :  { %v1342_v36 = vadd.f32 %v1338_v34, %v1985_v28  ;;  %v1341_v37 = vadd.f32 %v1336_v35, %v1982_v23  ;;  %v1369_v23 = vld [vmem:[%s2214_s4] sm:$0xff]  ;;  %v1374_v28 = vpack.c.bf16 %v1372_v40, %v1371_v39 }
0x1865   :  { %v1373_v42 = vpack.c.bf16 %v1370_v41, %v1369_v23 }
0x1866   :  { %1750 = vtanh.f32 %v1342_v36  ;;  %1632 = vmatpush3.bf16.msra.mxu0 %v1374_v28 }
0x1867   :  { %1752 = vtanh.f32 %v1341_v37  ;;  %1633 = vmatprep.subr.bf16.mxu0 %v1845_v0 }
0x186a   :  { %1634 = vmatpush3.bf16.msra.mxu0 %v1373_v42 }
0x1873   :  { %v1751_v38 = vpop.eup %1750 }
0x1874   :  { %v1753_v55 = vpop.eup %1752  ;;  %1351 = vrot.lane.b32.xlu1 %v1751_v38, %s1847_s13 }
0x1875   :  { %1349 = vrot.lane.b32.xlu0 %v1753_v55, %s1847_s13 }
0x18e6   :  { %v1352_v45 = vpop.permute.xlu1 %1351 }
0x18e7   :  { %v1356_v48 = vmul.f32 %v1352_v45, %v1346_v43  ;;  %v1350_v49 = vpop.permute.xlu0 %1349 }
0x18e8   :  { %v1355_v51 = vmul.f32 %v1350_v49, %v1345_v46 }
0x18e9   :  { %v1366_v52 = vadd.f32 %v1364_v47, %v1356_v48 }
0x18ea   :  { %v1365_v53 = vadd.f32 %v1363_v50, %v1355_v51 }
0x18eb   :  { %v1368_v54 = vpack.c.bf16 %v1366_v52, %v1366_v52 }
0x18ec   :  { %v1367_v56 = vpack.c.bf16 %v1365_v53, %v1365_v53 }
0x18ed   :  { %v1383_v57 = vunpack.c.l.b16 %v1368_v54 }
0x18ee   :  { %v1382_v58 = vunpack.c.l.b16 %v1367_v56 }
0x18ef   :  { %v1385_v0 = vrot.slane %v1383_v57, 6 }
0x18f0   :  { %v1384_v60 = vrot.slane %v1382_v58, 7 }
0x18f2   :  { %v1386_v61 = vsel %vm537_vm5, %v1385_v0, %v1384_v60 }
0x18f3   :  { %v1387_v63 = vpack.c.b16 %v1386_v61, %v1386_v61 }
0x18f5   :  { %1388 = vrot.lane.b32.xlu0 %v1387_v63, %s1847_s13 }
0x1967   :  { %v1389_v62 = vpop.permute.xlu0 %1388 }
0x1968   :  { %1636 = vmatmul.mubr.msk.bf16.vlgmr.msra.gmra.mxu0 %vm133_vm2, %v1389_v62 }
0x1a28   :  { %v1427_v2 = vpop.f32.mrf.mxu0 }
0x1a29   :  { %v1428_v3 = vadd.f32 %v1485_v1, %v1427_v2 }
0x1a2a   :  { %v1637_v4 = vpop.f32.mrf.mxu0 }
0x1a2b   :  { %1434 = vst.msk [vmem:[#allocation8] sm:$0x3] %vm1433_vm6, %v1428_v3 }
0x1a2c   :  { %v1430_v5 = vpop.f32.mrf.mxu0 }
0x1a2d   :  { %1825 = shalt.err (!%p1822_p5)
}
0x1a2e   :  { %1444 = dma.vmem_to_hbm [thread:$0]  %s1442_s1, 32, %s2216_s6, [#allocation4]   ;;  %v1638_v6 = vpop.f32.mrf.mxu0 }
0x1a2f   :  { %1838 = dma.done.wait [#allocation4], 32  }
0x1a30   :  { %1839 = vsyncadd [#allocation4], 4294967264 }
0x1a31   :  { %1448 = vsyncpa [#allocation3], 1 }
0x1a32   :  { %1449 = vsyncpa [#allocation6], 1 }
0x1a33   :  { %1450 = vsyncpa [#allocation4], 1 }

</bundles_post_ra>
